<compile_context>
chip_gen: v5e
topology: v5e:2x2
jax: 0.10.0
libtpu: 0.0.40
codegen_flags: <defaults>
</compile_context>

<pallas_src>
import numpy as np
import jax
import jax.numpy as jnp
from jax import lax
from jax.experimental import pallas as pl
from jax.experimental.pallas import tpu as pltpu


_OUT = 28            # output image side (out_size hard-coded in the reference)
_NPIX = _OUT * _OUT  # 784 output pixels, kept on the lane axis inside the kernel


# ---------------------------------------------------------------------------
# Trace-time constant: Catmull-Rom 1-D resize matrix (bicubic_interp_2d semantics:
# linspace source coordinates, 4 Hermite taps, indices clamped to the border).
# ---------------------------------------------------------------------------
def _catmull_rom_resize_matrix(src, dst):
    f = np.linspace(0.0, src - 1.0, dst) if dst > 1 else np.zeros((1,))
    i0 = np.floor(f).astype(np.int64)
    t = f - np.floor(f)
    w = np.stack([((-0.5 * t + 1.0) * t - 0.5) * t,      # tap -1
                  (1.5 * t - 2.5) * t * t + 1.0,         # tap  0
                  ((-1.5 * t + 2.0) * t + 0.5) * t,      # tap +1
                  (0.5 * t - 0.5) * t * t], axis=0)      # tap +2
    m = np.zeros((dst, src), np.float32)
    rows = np.arange(dst)
    for k in range(4):
        idx = np.clip(i0 + k - 1, 0, src - 1)
        np.add.at(m, (rows, idx), w[k])                  # clamped taps accumulate
    return m


# ---------------------------------------------------------------------------
# The Pallas kernel: one sample per grid step (grid axis = batch, "parallel").
#   imgT_ref : (28, 28)  transposed moving image  imgT[c, r] = img[r, c]
#   field_ref: (2, Hf*Wf) permuted field rows (channel-major, row-major spatial)
#   wrs_ref  : (Hf*Wf, 784) constant bicubic field-resize matrix (batch-independent)
#   base_ref : (2, 784)  normalized base grid (row 0 = x, row 1 = y)
#   out_ref  : (1, 784)  warped image row (lane-dense)
# ---------------------------------------------------------------------------
def _warp_kernel(imgT_ref, field_ref, wrs_ref, base_ref, out_ref):
    f32 = jnp.float32

    # ---- bicubic resize of the deformation field to 28x28, as one tiny matmul ---
    # V[c, p] = V_t[n, i, j, c] for p = i*28 + j.
    v = jnp.dot(field_ref[...], wrs_ref[...], preferred_element_type=f32)  # (2,784)

    # ---- sampling coordinates: base grid + displacement, align_corners mapping --
    base = base_ref[...]
    half = 0.5 * (_OUT - 1.0)
    fx = (base[0:1, :] + v[0:1, :] + 1.0) * half          # (1, 784) source column
    fy = (base[1:2, :] + v[1:2, :] + 1.0) * half          # (1, 784) source row

    # ---- gather-free Catmull-Rom tap profiles (shared iota, lane-dense) ---------
    src = lax.broadcasted_iota(jnp.int32, (_OUT, _NPIX), 0).astype(f32)

    def profile(f):
        f0 = jnp.floor(f)
        t = f - f0
        w = (((-0.5 * t + 1.0) * t - 0.5) * t,            # tap -1
             (1.5 * t - 2.5) * t * t + 1.0,               # tap  0
             ((-1.5 * t + 2.0) * t + 0.5) * t,            # tap +1
             (0.5 * t - 0.5) * t * t)                     # tap +2
        prof = jnp.zeros((_OUT, _NPIX), f32)
        for k in range(4):
            idx = jnp.clip(f0 + (k - 1.0), 0.0, _OUT - 1.0)   # clamped border taps
            prof = prof + w[k] * (src == idx).astype(f32)
        return prof

    p_row = profile(fy)                                   # (28 src rows, 784 pix)
    p_col = profile(fx)                                   # (28 src cols, 784 pix)

    # ---- y-pass: one MXU matmul with 784 lanes; x-pass: VPU combine + XLU reduce -
    tmp = jnp.dot(imgT_ref[...], p_row, preferred_element_type=f32)   # (28, 784)
    out_ref[...] = jnp.sum(p_col * tmp, axis=0, keepdims=True)        # (1, 784)


# ---------------------------------------------------------------------------
# Forward-pass wrapper (matches warpImage_pyTorchBicubic.forward(x, y))
# ---------------------------------------------------------------------------
def warp_image_bicubic(x, y):
    """x: moving image (N, 28, 28); y: deformation field (N, 2, h, w) (NCHW).

    Returns the bicubically warped image, shape (N, 28, 28, 1) float32.
    """
    n, ch, h, w = y.shape
    assert ch == 2, "deformation field must have 2 channels"
    assert x.shape == (n, _OUT, _OUT), "moving image must be (N, 28, 28)"
    hf, wf = w, h                       # spatial extents after permute(0, 3, 2, 1)

    # Constant bicubic resize folded into one (Hf*Wf, 784) matrix: batch-independent.
    ry = _catmull_rom_resize_matrix(hf, _OUT)             # (28, Hf)
    rx = _catmull_rom_resize_matrix(wf, _OUT)             # (28, Wf)
    wrs = np.einsum("ia,jb->abij", ry, rx).reshape(hf * wf, _NPIX)
    wrs = jnp.asarray(wrs, jnp.float32)

    # Normalized base grid (STN convention), row 0 = x (width), row 1 = y (height).
    p = np.arange(_NPIX)
    base = np.stack([-1.0 + 2.0 * (p % _OUT) / (_OUT - 1.0),
                     -1.0 + 2.0 * (p // _OUT) / (_OUT - 1.0)], axis=0)
    base = jnp.asarray(base, jnp.float32)                 # (2, 784)

    # Layout plumbing (pure XLA transposes on tiny data, no kernel work):
    #   imgT[n]       = x[n].T                              -> y-pass matmul LHS
    #   field_rows[n] = y[n].permute(0,..).flatten per chan -> resize matmul LHS
    img_t = jnp.swapaxes(x.astype(jnp.float32), 1, 2)                       # (N,28,28)
    field_rows = jnp.transpose(y.astype(jnp.float32),
                               (0, 1, 3, 2)).reshape(n, 2, hf * wf)         # (N,2,Hf*Wf)

    out = pl.pallas_call(
        _warp_kernel,
        out_shape=jax.ShapeDtypeStruct((n, 1, _NPIX), jnp.float32),
        grid=(n,),
        in_specs=[
            pl.BlockSpec((None, _OUT, _OUT), lambda i: (i, 0, 0)),
            pl.BlockSpec((None, 2, hf * wf), lambda i: (i, 0, 0)),
            pl.BlockSpec((hf * wf, _NPIX), lambda i: (0, 0)),   # constant, resident
            pl.BlockSpec((2, _NPIX), lambda i: (0, 0)),         # constant, resident
        ],
        out_specs=pl.BlockSpec((None, 1, _NPIX), lambda i: (i, 0, 0)),
        compiler_params=pltpu.CompilerParams(
            # Per-sample work is independent -> both v7x TensorCores can split it.
            # Working set (< 1 MiB) is far under the default scoped-VMEM limit, so
            # no vmem_limit_bytes override is needed (old 48 MiB request removed).
            dimension_semantics=("parallel",),
        ),
    )(img_t, field_rows, wrs, base)
    return out.reshape(n, _OUT, _OUT, 1)


# ---------------------------------------------------------------------------
# Pure-JAX reference (gather-based) used only for a correctness check in __main__
# ---------------------------------------------------------------------------
def _reference(x, y):
    n, _, h, w = y.shape
    hf, wf = w, h
    ry = jnp.asarray(_catmull_rom_resize_matrix(hf, _OUT))
    rx = jnp.asarray(_catmull_rom_resize_matrix(wf, _OUT))
    field_t = jnp.transpose(y.astype(jnp.float32), (0, 3, 2, 1))    # (n, hf, wf, 2)
    v = jnp.einsum("ia,jb,nabc->nijc", ry, rx, field_t)             # (n, 28, 28, 2)

    coords = -1.0 + 2.0 * jnp.arange(_OUT, dtype=jnp.float32) / (_OUT - 1.0)
    half = 0.5 * (_OUT - 1.0)
    fx = (coords[None, None, :] + v[..., 0] + 1.0) * half
    fy = (coords[None, :, None] + v[..., 1] + 1.0) * half

    def cubw(t):
        return jnp.stack([((-0.5 * t + 1.0) * t - 0.5) * t,
                          (1.5 * t - 2.5) * t * t + 1.0,
                          ((-1.5 * t + 2.0) * t + 0.5) * t,
                          (0.5 * t - 0.5) * t * t], axis=-1)

    x0, y0 = jnp.floor(fx), jnp.floor(fy)
    wx, wy = cubw(fx - x0), cubw(fy - y0)
    out = jnp.zeros((n, _OUT, _OUT), jnp.float32)
    for k in range(4):
        yi = jnp.clip(y0 + (k - 1.0), 0.0, _OUT - 1.0).astype(jnp.int32)
        for l in range(4):
            xi = jnp.clip(x0 + (l - 1.0), 0.0, _OUT - 1.0).astype(jnp.int32)
            vals = jax.vmap(lambda im, a, b: im[a, b])(x.astype(jnp.float32), yi, xi)
            out = out + wy[..., k] * wx[..., l] * vals
    return out[..., None]


if __name__ == "__main__":
    key = jax.random.PRNGKey(0)
    kx, ky = jax.random.split(key)
    x = jax.random.normal(kx, (2, _OUT, _OUT), dtype=jnp.float32)       # moving image
    y = 0.1 * jax.random.normal(ky, (2, 2, 7, 7), dtype=jnp.float32)    # coarse DVF

    fwd = jax.jit(warp_image_bicubic)
    out = jax.block_until_ready(fwd(x, y))

    assert out.shape == (2, _OUT, _OUT, 1)
    assert bool(jnp.all(jnp.isfinite(out)))
    ref = _reference(x, y)
    assert bool(jnp.allclose(out, ref, atol=2e-3, rtol=2e-3))
    print("KERNEL_OK")
</pallas_src>

<mosaic_0001>
module attributes {stable_mosaic.version = 11 : i64} {
  func.func @_warp_kernel(%arg0: i32, %arg1: memref<1x28x28xf32, #tpu.memory_space<vmem>>, %arg2: memref<1x2x49xf32, #tpu.memory_space<vmem>>, %arg3: memref<49x784xf32, #tpu.memory_space<vmem>>, %arg4: memref<2x784xf32, #tpu.memory_space<vmem>>, %arg5: memref<1x1x784xf32, #tpu.memory_space<vmem>>) attributes {dimension_semantics = [#tpu.dimension_semantics<parallel>], iteration_bounds = array<i64: 2>, scalar_prefetch = 0 : i64, scratch_operands = 0 : i64, tpu.core_type = #tpu.core_type<tc>, window_params = [{transform_indices = @transform_0, window_bounds = array<i64: 1, 28, 28>}, {transform_indices = @transform_1, window_bounds = array<i64: 1, 2, 49>}, {pipeline_mode = #tpu.pipeline_mode<synchronous>, transform_indices = @transform_2, window_bounds = array<i64: 49, 784>}, {pipeline_mode = #tpu.pipeline_mode<synchronous>, transform_indices = @transform_3, window_bounds = array<i64: 2, 784>}, {transform_indices = @transform_4, window_bounds = array<i64: 1, 1, 784>}]} {
    %c0 = arith.constant 0 : index
    %c0_0 = arith.constant 0 : index
    %c0_1 = arith.constant 0 : index
    %0 = vector.load %arg2[%c0, %c0_0, %c0_1] : memref<1x2x49xf32, #tpu.memory_space<vmem>>, vector<1x2x49xf32>
    %1 = vector.shape_cast %0 : vector<1x2x49xf32> to vector<2x49xf32>
    %c0_2 = arith.constant 0 : index
    %c0_3 = arith.constant 0 : index
    %2 = vector.load %arg3[%c0_2, %c0_3] : memref<49x784xf32, #tpu.memory_space<vmem>>, vector<49x784xf32>
    %cst = arith.constant dense<0.000000e+00> : vector<2x784xf32>
    %3 = tpu.matmul %1, %2, %cst {dimension_numbers = #tpu.dot_dimension_numbers<[1], [0], [0], [1], [0, 0, 1, 1], [], []>} : vector<2x49xf32>, vector<49x784xf32>, vector<2x784xf32> -> vector<2x784xf32>
    %c0_4 = arith.constant 0 : index
    %c0_5 = arith.constant 0 : index
    %4 = vector.load %arg4[%c0_4, %c0_5] : memref<2x784xf32, #tpu.memory_space<vmem>>, vector<2x784xf32>
    %5 = vector.extract_strided_slice %4 {offsets = [0, 0], sizes = [1, 784], strides = [1, 1]} : vector<2x784xf32> to vector<1x784xf32>
    %6 = vector.extract_strided_slice %3 {offsets = [0, 0], sizes = [1, 784], strides = [1, 1]} : vector<2x784xf32> to vector<1x784xf32>
    %7 = arith.addf %5, %6 : vector<1x784xf32>
    %cst_6 = arith.constant 1.000000e+00 : f32
    %8 = vector.broadcast %cst_6 : f32 to vector<1x784xf32>
    %9 = arith.addf %7, %8 : vector<1x784xf32>
    %cst_7 = arith.constant 1.350000e+01 : f32
    %10 = vector.broadcast %cst_7 : f32 to vector<1x784xf32>
    %11 = arith.mulf %9, %10 : vector<1x784xf32>
    %12 = vector.extract_strided_slice %4 {offsets = [1, 0], sizes = [1, 784], strides = [1, 1]} : vector<2x784xf32> to vector<1x784xf32>
    %13 = vector.extract_strided_slice %3 {offsets = [1, 0], sizes = [1, 784], strides = [1, 1]} : vector<2x784xf32> to vector<1x784xf32>
    %14 = arith.addf %12, %13 : vector<1x784xf32>
    %cst_8 = arith.constant 1.000000e+00 : f32
    %15 = vector.broadcast %cst_8 : f32 to vector<1x784xf32>
    %16 = arith.addf %14, %15 : vector<1x784xf32>
    %cst_9 = arith.constant 1.350000e+01 : f32
    %17 = vector.broadcast %cst_9 : f32 to vector<1x784xf32>
    %18 = arith.mulf %16, %17 : vector<1x784xf32>
    %19 = tpu.iota {dimensions = array<i32: 0>} : vector<28x784xi32>
    %20 = arith.sitofp %19 : vector<28x784xi32> to vector<28x784xf32>
    %21 = math.floor %18 : vector<1x784xf32>
    %22 = arith.subf %18, %21 : vector<1x784xf32>
    %cst_10 = arith.constant -5.000000e-01 : f32
    %23 = vector.broadcast %cst_10 : f32 to vector<1x784xf32>
    %24 = arith.mulf %23, %22 : vector<1x784xf32>
    %cst_11 = arith.constant 1.000000e+00 : f32
    %25 = vector.broadcast %cst_11 : f32 to vector<1x784xf32>
    %26 = arith.addf %24, %25 : vector<1x784xf32>
    %27 = arith.mulf %26, %22 : vector<1x784xf32>
    %cst_12 = arith.constant 5.000000e-01 : f32
    %28 = vector.broadcast %cst_12 : f32 to vector<1x784xf32>
    %29 = arith.subf %27, %28 : vector<1x784xf32>
    %30 = arith.mulf %29, %22 : vector<1x784xf32>
    %cst_13 = arith.constant 1.500000e+00 : f32
    %31 = vector.broadcast %cst_13 : f32 to vector<1x784xf32>
    %32 = arith.mulf %31, %22 : vector<1x784xf32>
    %cst_14 = arith.constant 2.500000e+00 : f32
    %33 = vector.broadcast %cst_14 : f32 to vector<1x784xf32>
    %34 = arith.subf %32, %33 : vector<1x784xf32>
    %35 = arith.mulf %34, %22 : vector<1x784xf32>
    %36 = arith.mulf %35, %22 : vector<1x784xf32>
    %cst_15 = arith.constant 1.000000e+00 : f32
    %37 = vector.broadcast %cst_15 : f32 to vector<1x784xf32>
    %38 = arith.addf %36, %37 : vector<1x784xf32>
    %cst_16 = arith.constant -1.500000e+00 : f32
    %39 = vector.broadcast %cst_16 : f32 to vector<1x784xf32>
    %40 = arith.mulf %39, %22 : vector<1x784xf32>
    %cst_17 = arith.constant 2.000000e+00 : f32
    %41 = vector.broadcast %cst_17 : f32 to vector<1x784xf32>
    %42 = arith.addf %40, %41 : vector<1x784xf32>
    %43 = arith.mulf %42, %22 : vector<1x784xf32>
    %cst_18 = arith.constant 5.000000e-01 : f32
    %44 = vector.broadcast %cst_18 : f32 to vector<1x784xf32>
    %45 = arith.addf %43, %44 : vector<1x784xf32>
    %46 = arith.mulf %45, %22 : vector<1x784xf32>
    %cst_19 = arith.constant 5.000000e-01 : f32
    %47 = vector.broadcast %cst_19 : f32 to vector<1x784xf32>
    %48 = arith.mulf %47, %22 : vector<1x784xf32>
    %cst_20 = arith.constant 5.000000e-01 : f32
    %49 = vector.broadcast %cst_20 : f32 to vector<1x784xf32>
    %50 = arith.subf %48, %49 : vector<1x784xf32>
    %51 = arith.mulf %50, %22 : vector<1x784xf32>
    %52 = arith.mulf %51, %22 : vector<1x784xf32>
    %cst_21 = arith.constant 0.000000e+00 : f32
    %53 = vector.broadcast %cst_21 : f32 to vector<28x784xf32>
    %cst_22 = arith.constant -1.000000e+00 : f32
    %54 = vector.broadcast %cst_22 : f32 to vector<1x784xf32>
    %55 = arith.addf %21, %54 : vector<1x784xf32>
    %cst_23 = arith.constant 0.000000e+00 : f32
    %cst_24 = arith.constant 2.700000e+01 : f32
    %56 = vector.broadcast %cst_23 : f32 to vector<1x784xf32>
    %57 = arith.maximumf %56, %55 : vector<1x784xf32>
    %58 = vector.broadcast %cst_24 : f32 to vector<1x784xf32>
    %59 = arith.minimumf %58, %57 : vector<1x784xf32>
    %60 = vector.broadcast %59 : vector<1x784xf32> to vector<28x784xf32>
    %61 = arith.cmpf oeq, %20, %60 : vector<28x784xf32>
    %62 = arith.extui %61 : vector<28x784xi1> to vector<28x784xi32>
    %63 = arith.sitofp %62 : vector<28x784xi32> to vector<28x784xf32>
    %64 = vector.broadcast %30 : vector<1x784xf32> to vector<28x784xf32>
    %65 = arith.mulf %64, %63 : vector<28x784xf32>
    %66 = arith.addf %53, %65 : vector<28x784xf32>
    %cst_25 = arith.constant 0.000000e+00 : f32
    %67 = vector.broadcast %cst_25 : f32 to vector<1x784xf32>
    %68 = arith.addf %21, %67 : vector<1x784xf32>
    %cst_26 = arith.constant 0.000000e+00 : f32
    %cst_27 = arith.constant 2.700000e+01 : f32
    %69 = vector.broadcast %cst_26 : f32 to vector<1x784xf32>
    %70 = arith.maximumf %69, %68 : vector<1x784xf32>
    %71 = vector.broadcast %cst_27 : f32 to vector<1x784xf32>
    %72 = arith.minimumf %71, %70 : vector<1x784xf32>
    %73 = vector.broadcast %72 : vector<1x784xf32> to vector<28x784xf32>
    %74 = arith.cmpf oeq, %20, %73 : vector<28x784xf32>
    %75 = arith.extui %74 : vector<28x784xi1> to vector<28x784xi32>
    %76 = arith.sitofp %75 : vector<28x784xi32> to vector<28x784xf32>
    %77 = vector.broadcast %38 : vector<1x784xf32> to vector<28x784xf32>
    %78 = arith.mulf %77, %76 : vector<28x784xf32>
    %79 = arith.addf %66, %78 : vector<28x784xf32>
    %cst_28 = arith.constant 1.000000e+00 : f32
    %80 = vector.broadcast %cst_28 : f32 to vector<1x784xf32>
    %81 = arith.addf %21, %80 : vector<1x784xf32>
    %cst_29 = arith.constant 0.000000e+00 : f32
    %cst_30 = arith.constant 2.700000e+01 : f32
    %82 = vector.broadcast %cst_29 : f32 to vector<1x784xf32>
    %83 = arith.maximumf %82, %81 : vector<1x784xf32>
    %84 = vector.broadcast %cst_30 : f32 to vector<1x784xf32>
    %85 = arith.minimumf %84, %83 : vector<1x784xf32>
    %86 = vector.broadcast %85 : vector<1x784xf32> to vector<28x784xf32>
    %87 = arith.cmpf oeq, %20, %86 : vector<28x784xf32>
    %88 = arith.extui %87 : vector<28x784xi1> to vector<28x784xi32>
    %89 = arith.sitofp %88 : vector<28x784xi32> to vector<28x784xf32>
    %90 = vector.broadcast %46 : vector<1x784xf32> to vector<28x784xf32>
    %91 = arith.mulf %90, %89 : vector<28x784xf32>
    %92 = arith.addf %79, %91 : vector<28x784xf32>
    %cst_31 = arith.constant 2.000000e+00 : f32
    %93 = vector.broadcast %cst_31 : f32 to vector<1x784xf32>
    %94 = arith.addf %21, %93 : vector<1x784xf32>
    %cst_32 = arith.constant 0.000000e+00 : f32
    %cst_33 = arith.constant 2.700000e+01 : f32
    %95 = vector.broadcast %cst_32 : f32 to vector<1x784xf32>
    %96 = arith.maximumf %95, %94 : vector<1x784xf32>
    %97 = vector.broadcast %cst_33 : f32 to vector<1x784xf32>
    %98 = arith.minimumf %97, %96 : vector<1x784xf32>
    %99 = vector.broadcast %98 : vector<1x784xf32> to vector<28x784xf32>
    %100 = arith.cmpf oeq, %20, %99 : vector<28x784xf32>
    %101 = arith.extui %100 : vector<28x784xi1> to vector<28x784xi32>
    %102 = arith.sitofp %101 : vector<28x784xi32> to vector<28x784xf32>
    %103 = vector.broadcast %52 : vector<1x784xf32> to vector<28x784xf32>
    %104 = arith.mulf %103, %102 : vector<28x784xf32>
    %105 = arith.addf %92, %104 : vector<28x784xf32>
    %106 = math.floor %11 : vector<1x784xf32>
    %107 = arith.subf %11, %106 : vector<1x784xf32>
    %cst_34 = arith.constant -5.000000e-01 : f32
    %108 = vector.broadcast %cst_34 : f32 to vector<1x784xf32>
    %109 = arith.mulf %108, %107 : vector<1x784xf32>
    %cst_35 = arith.constant 1.000000e+00 : f32
    %110 = vector.broadcast %cst_35 : f32 to vector<1x784xf32>
    %111 = arith.addf %109, %110 : vector<1x784xf32>
    %112 = arith.mulf %111, %107 : vector<1x784xf32>
    %cst_36 = arith.constant 5.000000e-01 : f32
    %113 = vector.broadcast %cst_36 : f32 to vector<1x784xf32>
    %114 = arith.subf %112, %113 : vector<1x784xf32>
    %115 = arith.mulf %114, %107 : vector<1x784xf32>
    %cst_37 = arith.constant 1.500000e+00 : f32
    %116 = vector.broadcast %cst_37 : f32 to vector<1x784xf32>
    %117 = arith.mulf %116, %107 : vector<1x784xf32>
    %cst_38 = arith.constant 2.500000e+00 : f32
    %118 = vector.broadcast %cst_38 : f32 to vector<1x784xf32>
    %119 = arith.subf %117, %118 : vector<1x784xf32>
    %120 = arith.mulf %119, %107 : vector<1x784xf32>
    %121 = arith.mulf %120, %107 : vector<1x784xf32>
    %cst_39 = arith.constant 1.000000e+00 : f32
    %122 = vector.broadcast %cst_39 : f32 to vector<1x784xf32>
    %123 = arith.addf %121, %122 : vector<1x784xf32>
    %cst_40 = arith.constant -1.500000e+00 : f32
    %124 = vector.broadcast %cst_40 : f32 to vector<1x784xf32>
    %125 = arith.mulf %124, %107 : vector<1x784xf32>
    %cst_41 = arith.constant 2.000000e+00 : f32
    %126 = vector.broadcast %cst_41 : f32 to vector<1x784xf32>
    %127 = arith.addf %125, %126 : vector<1x784xf32>
    %128 = arith.mulf %127, %107 : vector<1x784xf32>
    %cst_42 = arith.constant 5.000000e-01 : f32
    %129 = vector.broadcast %cst_42 : f32 to vector<1x784xf32>
    %130 = arith.addf %128, %129 : vector<1x784xf32>
    %131 = arith.mulf %130, %107 : vector<1x784xf32>
    %cst_43 = arith.constant 5.000000e-01 : f32
    %132 = vector.broadcast %cst_43 : f32 to vector<1x784xf32>
    %133 = arith.mulf %132, %107 : vector<1x784xf32>
    %cst_44 = arith.constant 5.000000e-01 : f32
    %134 = vector.broadcast %cst_44 : f32 to vector<1x784xf32>
    %135 = arith.subf %133, %134 : vector<1x784xf32>
    %136 = arith.mulf %135, %107 : vector<1x784xf32>
    %137 = arith.mulf %136, %107 : vector<1x784xf32>
    %cst_45 = arith.constant 0.000000e+00 : f32
    %138 = vector.broadcast %cst_45 : f32 to vector<28x784xf32>
    %cst_46 = arith.constant -1.000000e+00 : f32
    %139 = vector.broadcast %cst_46 : f32 to vector<1x784xf32>
    %140 = arith.addf %106, %139 : vector<1x784xf32>
    %cst_47 = arith.constant 0.000000e+00 : f32
    %cst_48 = arith.constant 2.700000e+01 : f32
    %141 = vector.broadcast %cst_47 : f32 to vector<1x784xf32>
    %142 = arith.maximumf %141, %140 : vector<1x784xf32>
    %143 = vector.broadcast %cst_48 : f32 to vector<1x784xf32>
    %144 = arith.minimumf %143, %142 : vector<1x784xf32>
    %145 = vector.broadcast %144 : vector<1x784xf32> to vector<28x784xf32>
    %146 = arith.cmpf oeq, %20, %145 : vector<28x784xf32>
    %147 = arith.extui %146 : vector<28x784xi1> to vector<28x784xi32>
    %148 = arith.sitofp %147 : vector<28x784xi32> to vector<28x784xf32>
    %149 = vector.broadcast %115 : vector<1x784xf32> to vector<28x784xf32>
    %150 = arith.mulf %149, %148 : vector<28x784xf32>
    %151 = arith.addf %138, %150 : vector<28x784xf32>
    %cst_49 = arith.constant 0.000000e+00 : f32
    %152 = vector.broadcast %cst_49 : f32 to vector<1x784xf32>
    %153 = arith.addf %106, %152 : vector<1x784xf32>
    %cst_50 = arith.constant 0.000000e+00 : f32
    %cst_51 = arith.constant 2.700000e+01 : f32
    %154 = vector.broadcast %cst_50 : f32 to vector<1x784xf32>
    %155 = arith.maximumf %154, %153 : vector<1x784xf32>
    %156 = vector.broadcast %cst_51 : f32 to vector<1x784xf32>
    %157 = arith.minimumf %156, %155 : vector<1x784xf32>
    %158 = vector.broadcast %157 : vector<1x784xf32> to vector<28x784xf32>
    %159 = arith.cmpf oeq, %20, %158 : vector<28x784xf32>
    %160 = arith.extui %159 : vector<28x784xi1> to vector<28x784xi32>
    %161 = arith.sitofp %160 : vector<28x784xi32> to vector<28x784xf32>
    %162 = vector.broadcast %123 : vector<1x784xf32> to vector<28x784xf32>
    %163 = arith.mulf %162, %161 : vector<28x784xf32>
    %164 = arith.addf %151, %163 : vector<28x784xf32>
    %cst_52 = arith.constant 1.000000e+00 : f32
    %165 = vector.broadcast %cst_52 : f32 to vector<1x784xf32>
    %166 = arith.addf %106, %165 : vector<1x784xf32>
    %cst_53 = arith.constant 0.000000e+00 : f32
    %cst_54 = arith.constant 2.700000e+01 : f32
    %167 = vector.broadcast %cst_53 : f32 to vector<1x784xf32>
    %168 = arith.maximumf %167, %166 : vector<1x784xf32>
    %169 = vector.broadcast %cst_54 : f32 to vector<1x784xf32>
    %170 = arith.minimumf %169, %168 : vector<1x784xf32>
    %171 = vector.broadcast %170 : vector<1x784xf32> to vector<28x784xf32>
    %172 = arith.cmpf oeq, %20, %171 : vector<28x784xf32>
    %173 = arith.extui %172 : vector<28x784xi1> to vector<28x784xi32>
    %174 = arith.sitofp %173 : vector<28x784xi32> to vector<28x784xf32>
    %175 = vector.broadcast %131 : vector<1x784xf32> to vector<28x784xf32>
    %176 = arith.mulf %175, %174 : vector<28x784xf32>
    %177 = arith.addf %164, %176 : vector<28x784xf32>
    %cst_55 = arith.constant 2.000000e+00 : f32
    %178 = vector.broadcast %cst_55 : f32 to vector<1x784xf32>
    %179 = arith.addf %106, %178 : vector<1x784xf32>
    %cst_56 = arith.constant 0.000000e+00 : f32
    %cst_57 = arith.constant 2.700000e+01 : f32
    %180 = vector.broadcast %cst_56 : f32 to vector<1x784xf32>
    %181 = arith.maximumf %180, %179 : vector<1x784xf32>
    %182 = vector.broadcast %cst_57 : f32 to vector<1x784xf32>
    %183 = arith.minimumf %182, %181 : vector<1x784xf32>
    %184 = vector.broadcast %183 : vector<1x784xf32> to vector<28x784xf32>
    %185 = arith.cmpf oeq, %20, %184 : vector<28x784xf32>
    %186 = arith.extui %185 : vector<28x784xi1> to vector<28x784xi32>
    %187 = arith.sitofp %186 : vector<28x784xi32> to vector<28x784xf32>
    %188 = vector.broadcast %137 : vector<1x784xf32> to vector<28x784xf32>
    %189 = arith.mulf %188, %187 : vector<28x784xf32>
    %190 = arith.addf %177, %189 : vector<28x784xf32>
    %c0_58 = arith.constant 0 : index
    %c0_59 = arith.constant 0 : index
    %c0_60 = arith.constant 0 : index
    %191 = vector.load %arg1[%c0_58, %c0_59, %c0_60] : memref<1x28x28xf32, #tpu.memory_space<vmem>>, vector<1x28x28xf32>
    %192 = vector.shape_cast %191 : vector<1x28x28xf32> to vector<28x28xf32>
    %cst_61 = arith.constant dense<0.000000e+00> : vector<28x784xf32>
    %193 = tpu.matmul %192, %105, %cst_61 {dimension_numbers = #tpu.dot_dimension_numbers<[1], [0], [0], [1], [0, 0, 1, 1], [], []>} : vector<28x28xf32>, vector<28x784xf32>, vector<28x784xf32> -> vector<28x784xf32>
    %194 = arith.mulf %190, %193 : vector<28x784xf32>
    %cst_62 = arith.constant dense<0.000000e+00> : vector<784xf32>
    %195 = vector.multi_reduction <add>, %194, %cst_62 [0] : vector<28x784xf32> to vector<784xf32>
    %196 = vector.shape_cast %195 : vector<784xf32> to vector<1x784xf32>
    %c0_63 = arith.constant 0 : index
    %c0_64 = arith.constant 0 : index
    %c0_65 = arith.constant 0 : index
    %197 = vector.load %arg5[%c0_63, %c0_64, %c0_65] : memref<1x1x784xf32, #tpu.memory_space<vmem>>, vector<1x1x784xf32>
    %198 = vector.shape_cast %197 : vector<1x1x784xf32> to vector<1x784xf32>
    %199 = vector.shape_cast %196 : vector<1x784xf32> to vector<1x1x784xf32>
    tpu.vector_store %arg5[%c0_63, %c0_64, %c0_65], %199 {strides = array<i32>} : memref<1x1x784xf32, #tpu.memory_space<vmem>>, vector<1x1x784xf32>,
    return
  }
  func.func @transform_0(%arg0: i32) -> (i32, i32, i32) {
    %c0_i32 = arith.constant 0 : i32
    %c0_i32_0 = arith.constant 0 : i32
    %c0_i32_1 = arith.constant 0 : i32
    return %arg0, %c0_i32, %c0_i32_0 : i32, i32, i32
  }
  func.func @transform_1(%arg0: i32) -> (i32, i32, i32) {
    %c0_i32 = arith.constant 0 : i32
    %c0_i32_0 = arith.constant 0 : i32
    %c0_i32_1 = arith.constant 0 : i32
    return %arg0, %c0_i32, %c0_i32_0 : i32, i32, i32
  }
  func.func @transform_2(%arg0: i32) -> (i32, i32) {
    %c0_i32 = arith.constant 0 : i32
    %c0_i32_0 = arith.constant 0 : i32
    %c0_i32_1 = arith.constant 0 : i32
    return %c0_i32, %c0_i32_0 : i32, i32
  }
  func.func @transform_3(%arg0: i32) -> (i32, i32) {
    %c0_i32 = arith.constant 0 : i32
    %c0_i32_0 = arith.constant 0 : i32
    %c0_i32_1 = arith.constant 0 : i32
    return %c0_i32, %c0_i32_0 : i32, i32
  }
  func.func @transform_4(%arg0: i32) -> (i32, i32, i32) {
    %c0_i32 = arith.constant 0 : i32
    %c0_i32_0 = arith.constant 0 : i32
    %c0_i32_1 = arith.constant 0 : i32
    return %arg0, %c0_i32, %c0_i32_0 : i32, i32, i32
  }
}

</mosaic_0001>

<bundles_post_ra>
// kernel: warp_image_bicubic.1
= control target key start
LH: loop header
LB: loop body
LE: loop exit
PB: predicated region body
PF: predicated region fallthrough
CT: control target
= control target key end

     0   :  { %9 = vsyncpa [#allocation3], 0  ;;  %s2861_s15 = smov 0   ;;  %s4448_s0 = inlined_call_operand.vmem [shape: f32[2,28,28], index: 0, kind: input, shape index: {}]   ;;  %s4449_s1 = inlined_call_operand.vmem [shape: f32[2,2,49], index: 1, kind: input, shape index: {}]   ;;  %s4450_s2 = inlined_call_operand.hbm [shape: f32[49,784], index: 2, kind: input, shape index: {}]   ;;  %s4451_s3 = inlined_call_operand.vmem [shape: f32[2,784], index: 3, kind: input, shape index: {}]   ;;  %s4452_s4 = inlined_call_operand.vmem [shape: f32[2,1,784], index: 4, kind: output, shape index: {}]  }
   0x1 LB: > { %s151_s18 = sshll.u32 %s4450_s2, 4  ;;  %s2471_s19 = sadd.s32 4294967295, %s2830_s15   ;;  %s2830_s15 = sphi %s2861_s15, %s15_s15   ;;  %s152_s18 = int_to_ptr.hbm [resolvable:$true] %s151_s18 }
   0x2   : > { %p2473_p0 = scmp.ge.s32.totalorder %s2830_s15, 1  ;;  %p140_p1 = scmp.lt.s32.totalorder %s2830_s15, 3 }
   0x3   : > { %p2776_p2 = scmp.eq.s32.totalorder %s2471_s19, 0  ;;  %s2832_s20 = smov [#allocation2]  }
   0x4   : > { %p141_p3 = pnand %p2473_p0, %p140_p1  ;;  %s153_s21 = sshll.u32 %s2832_s20, 4  ;;  %s154_s21 = int_to_ptr.vmem [resolvable:$true] %s153_s21 }
   0x5   : > { %s2833_s22 = smov 896   ;;  %s2834_s23 = smov 56  }
   0x6   : > { %p2772_p4 = pneg %p141_p3  ;;  %187 = sbr.rel (%p141_p3) target bundleno = 514 (0x202), region = 36 }
   0x8   : > { %p2773_p5 = pnand %p2776_p2, %p2772_p4 }
   0xa   : > { %2775 = dma.hbm_to_vmem [thread:$0]  (!%p2773_p5), %s152_s18, 6272, %s154_s21, [#allocation3], %s2833_s22, %s2833_s22, %s2834_s23  }
   0xb   : > { %2825 = dma.done.wait (%p2776_p2), [#allocation3], 6272  }
   0xc   : > { %2827 = vsyncadd (%p2776_p2), [#allocation3], 4294961024  ;;  %vm284_vm0 = vcmask 1040384   ;;  %p217_p6 = scmp.lt.s32.totalorder %s2471_s19, 1  ;;  %v273_v0 = vld [vmem:[#allocation2 + $0x150] sm:$0x1]  ;;  %v4453_v56 = vlaneseq }
   0xd   : > { %v266_v1 = vld [vmem:[#allocation2 + $0x118] sm:$0xff]  ;;  %2481 = vmatpush.msk.msra.mxu2 %vm284_vm0, %v273_v0  ;;  %v259_v2 = vld [vmem:[#allocation2 + $0xe0] sm:$0xff]  ;;  %v276_v4 = vld [vmem:[#allocation2 + $0x168] sm:$0x1]  ;;  %vm280_vm1 = vcmask 400384   ;;  %vm462_vm2 = vcmask 1045508  }
   0xe   : > { %v274_v3 = vld [vmem:[#allocation2 + $0x158] sm:$0x1]  ;;  %s4493_s19 = smov (!%p217_p6, %s2471_s19), 1  ;;  %v267_v5 = vld [vmem:[#allocation2 + $0x120] sm:$0xff]  ;;  %v252_v6 = vld [vmem:[#allocation2 + $0xa8] sm:$0xff]  ;;  %2487 = vmatpush.msk.msra.mxu3 %vm284_vm0, %v276_v4  ;;  %vm460_vm3 = vcmask 1041408  }
   0xf   : > { %316 = vmatpush.msra.mxu2 %v266_v1  ;;  %2483 = vmatpush.msk.msra.mxu1 %vm284_vm0, %v274_v3  ;;  %v269_v7 = vld [vmem:[#allocation2 + $0x130] sm:$0xff]  ;;  %v260_v8 = vld [vmem:[#allocation2 + $0xe8] sm:$0xff]  ;;  %v262_v9 = vld [vmem:[#allocation2 + $0xf8] sm:$0xff]  ;;  %s2480_s24 = sshll.u32 %s4493_s19, 1  ;;  %vm464_vm4 = vcmask 1043456   ;;  %v2908_v62 = vshrl.u32 %v4453_v56, 7 }
  0x10   : > { %v245_v10 = vld [vmem:[#allocation2 + $0x70] sm:$0xff]  ;;  %376 = vmatpush.msra.mxu3 %v269_v7  ;;  %v255_v12 = vld [vmem:[#allocation2 + $0xc0] sm:$0xff]  ;;  %v238_v13 = vld [vmem:[#allocation2 + $0x38] sm:$0xff]  ;;  %s225_s27 = scalar_lea.vmem %s4449_s1, %s2480_s24  ;;  %s2762_s6 = sshll.u32 %s4493_s19, 5 }
  0x11   : > { %317 = vmatpush.msra.mxu2 %v259_v2  ;;  %336 = vmatpush.msra.mxu1 %v267_v5  ;;  %v253_v11 = vld [vmem:[#allocation2 + $0xb0] sm:$0xff]  ;;  %v246_v14 = vld [vmem:[#allocation2 + $0x78] sm:$0xff]  ;;  %v248_v15 = vld [vmem:[#allocation2 + $0x88] sm:$0xff]  ;;  %v480_v2 = vadd.s32 24, %v2908_v62  ;;  %s3206_s9 = scalar_lea.vmem %s4448_s0, %s2762_s6  ;;  %s2767_s10 = smul.u32 7, %s4493_s19 }
  0x12   : > { %377 = vmatpush.msra.mxu3 %v262_v9  ;;  %v231_v16 = vld [vmem:[#allocation2] sm:$0xff]  ;;  %v241_v19 = vld [vmem:[#allocation2 + $0x50] sm:$0xff]  ;;  %v232_v22 = vld [vmem:[#allocation2 + $0x8] sm:$0xff] }
  0x13   : > { %318 = vmatpush.msra.mxu2 %v252_v6  ;;  %337 = vmatpush.msra.mxu1 %v260_v8  ;;  %v239_v17 = vld [vmem:[#allocation2 + $0x40] sm:$0xff]  ;;  %v277_v20 = vld [vmem:[#allocation2 + $0x170] sm:$0x1]  ;;  %v268_v23 = vld [vmem:[#allocation2 + $0x128] sm:$0xff]  ;;  %v2911_v7 = vcvt.s32.f32 %v480_v2  ;;  %s229_s13 = scalar_lea.vmem %s4452_s4, %s2767_s10 }
  0x14   : > { %378 = vmatpush.msra.mxu3 %v255_v12  ;;  %v275_v18 = vld [vmem:[#allocation2 + $0x160] sm:$0x1]  ;;  %2489 = vmatpush.msk.msra.mxu0 %vm284_vm0, %v277_v20  ;;  %v234_v24 = vld [vmem:[#allocation2 + $0x18] sm:$0xff]  ;;  %v261_v25 = vld [vmem:[#allocation2 + $0xf0] sm:$0xff] }
  0x15   : > { %319 = vmatpush.msra.mxu2 %v245_v10  ;;  %338 = vmatpush.msra.mxu1 %v253_v11  ;;  %v2881_v21 = vld [vmem:[%s225_s27] sm:$0x3]  ;;  %v278_v26 = vld [vmem:[#allocation2 + $0x178] sm:$0x1]  ;;  %v264_v32 = vld [vmem:[#allocation2 + $0x108] sm:$0xff] }
  0x16   : > { %379 = vmatpush.msra.mxu3 %v248_v15  ;;  %v270_v27 = vld [vmem:[#allocation2 + $0x138] sm:$0xff]  ;;  %v271_v29 = vld [vmem:[#allocation2 + $0x140] sm:$0xff]  ;;  %v256_v33 = vld [vmem:[#allocation2 + $0xc8] sm:$0xff]  ;;  %v479_v15 = vadd.s32 16, %v2908_v62 }
  0x17   : > { %320 = vmatpush.msra.mxu2 %v238_v13  ;;  %339 = vmatpush.msra.mxu1 %v246_v14  ;;  %v254_v28 = vld [vmem:[#allocation2 + $0xb8] sm:$0xff]  ;;  %v263_v30 = vld [vmem:[#allocation2 + $0x100] sm:$0xff]  ;;  %v240_v34 = vld [vmem:[#allocation2 + $0x48] sm:$0xff] }
  0x18   : > { %380 = vmatpush.msra.mxu3 %v241_v19  ;;  %v247_v31 = vld [vmem:[#allocation2 + $0x80] sm:$0xff]  ;;  %396 = vmatpush.msra.mxu0 %v270_v27  ;;  %v257_v35 = vld [vmem:[#allocation2 + $0xd0] sm:$0xff]  ;;  %v250_v38 = vld [vmem:[#allocation2 + $0x98] sm:$0xff] }
  0x19   : > { %321 = vmatpush.msra.mxu2 %v231_v16  ;;  %340 = vmatpush.msra.mxu1 %v239_v17  ;;  %v249_v36 = vld [vmem:[#allocation2 + $0x90] sm:$0xff]  ;;  %v242_v39 = vld [vmem:[#allocation2 + $0x58] sm:$0xff]  ;;  %v279_v40 = vld [vmem:[#allocation2 + $0x180] sm:$0x1] }
  0x1a   : > { %2482 = vmatmul.msk.f32.vlgmr.msra.gmra.mxu2 %vm280_vm1, %v2881_v21  ;;  %381 = vmatpush.msra.mxu3 %v234_v24  ;;  %v233_v37 = vld [vmem:[#allocation2 + $0x10] sm:$0xff]  ;;  %v243_v41 = vld [vmem:[#allocation2 + $0x60] sm:$0xff]  ;;  %v272_v43 = vld [vmem:[#allocation2 + $0x148] sm:$0xff] }
  0x1b   : > { %2485 = vmatpush.msk.msrb.mxu2 %vm284_vm0, %v275_v18  ;;  %341 = vmatpush.msra.mxu1 %v232_v22  ;;  %v235_v42 = vld [vmem:[#allocation2 + $0x20] sm:$0xff]  ;;  %v236_v44 = vld [vmem:[#allocation2 + $0x28] sm:$0xff]  ;;  %v265_v45 = vld [vmem:[#allocation2 + $0x110] sm:$0xff] }
  0x1c   : > { %2484 = vmatmul.msk.f32.vlgmr.msra.gmra.mxu1 %vm280_vm1, %v2881_v21  ;;  %2488 = vmatmul.msk.f32.vlgmr.msra.gmra.mxu3 %vm280_vm1, %v2881_v21  ;;  %v258_v46 = vld [vmem:[#allocation2 + $0xd8] sm:$0xff]  ;;  %v251_v47 = vld [vmem:[#allocation2 + $0xa0] sm:$0xff]  ;;  %v244_v48 = vld [vmem:[#allocation2 + $0x68] sm:$0xff] }
  0x1d   : > { %356 = vmatpush.msrb.mxu2 %v268_v23  ;;  %2491 = vmatpush.msk.msrb.mxu1 %vm284_vm0, %v278_v26  ;;  %v237_v49 = vld [vmem:[#allocation2 + $0x30] sm:$0xff]  ;;  %v446_v58 = vld [vmem:[%s4451_s3] sm:$0xff]  ;;  %v447_v17 = vld [vmem:[%s4451_s3 + $0x8] sm:$0x3f] }
  0x1e   : > { %397 = vmatpush.msra.mxu0 %v263_v30 }
  0x1f   : > { %357 = vmatpush.msrb.mxu2 %v261_v25  ;;  %416 = vmatpush.msrb.mxu1 %v271_v29 }
  0x20   : > { %398 = vmatpush.msra.mxu0 %v256_v33 }
  0x21   : > { %358 = vmatpush.msrb.mxu2 %v254_v28  ;;  %417 = vmatpush.msrb.mxu1 %v264_v32 }
  0x22   : > { %399 = vmatpush.msra.mxu0 %v249_v36 }
  0x23   : > { %359 = vmatpush.msrb.mxu2 %v247_v31  ;;  %418 = vmatpush.msrb.mxu1 %v257_v35 }
  0x24   : > { %400 = vmatpush.msra.mxu0 %v242_v39 }
  0x25   : > { %360 = vmatpush.msrb.mxu2 %v240_v34  ;;  %419 = vmatpush.msrb.mxu1 %v250_v38 }
  0x26   : > { %401 = vmatpush.msra.mxu0 %v235_v42 }
  0x27   : > { %361 = vmatpush.msrb.mxu2 %v233_v37  ;;  %420 = vmatpush.msrb.mxu1 %v243_v41 }
  0x28   : > { %2486 = vmatmul.msk.f32.vlgmr.msrb.gmra.mxu2 %vm280_vm1, %v2881_v21  ;;  %2490 = vmatmul.msk.f32.vlgmr.msra.gmra.mxu0 %vm280_vm1, %v2881_v21 }
  0x29   : > { %2493 = vmatpush.msk.msra.mxu2 %vm284_vm0, %v279_v40  ;;  %421 = vmatpush.msrb.mxu1 %v236_v44 }
  0x2a   : > { %2492 = vmatmul.msk.f32.vlgmr.msrb.gmra.mxu1 %vm280_vm1, %v2881_v21 }
  0x2b   : > { %436 = vmatpush.msra.mxu2 %v272_v43 }
  0x2d   : > { %437 = vmatpush.msra.mxu2 %v265_v45 }
  0x2f   : > { %438 = vmatpush.msra.mxu2 %v258_v46 }
  0x31   : > { %439 = vmatpush.msra.mxu2 %v251_v47 }
  0x33   : > { %440 = vmatpush.msra.mxu2 %v244_v48 }
  0x35   : > { %441 = vmatpush.msra.mxu2 %v237_v49 }
  0x36   : > { %2494 = vmatmul.msk.f32.vlgmr.msra.gmra.mxu2 %vm280_vm1, %v2881_v21 }
  0x99   : > { %v343_v51 = vpop.f32.mrf.mxu1 }
  0x9a   : > { %v455_v53 = vrot.slane %v343_v51, 6 }
  0x9d   : > { %v323_v50 = vpop.f32.mrf.mxu2 }
  0x9e   : > { %v461_v60 = vsel %vm460_vm3, %v323_v50, %v455_v53  ;;  %v2940_v50 = vcvt.s32.f32 %v479_v15 }
  0x9f   : > { %v383_v52 = vpop.f32.mrf.mxu3 }
  0xa0   : > { %v457_v54 = vrot.slane %v383_v52, 2 }
  0xa5   : > { %v403_v5 = vpop.f32.mrf.mxu0 }
  0xa7   : > { %v423_v0 = vpop.f32.mrf.mxu1 }
  0xa8   : > { %v458_v4 = vrot.slane %v423_v0, 6 }
  0xaa   : > { %v466_v13 = vsel %vm460_vm3, %v403_v5, %v458_v4 }
  0xab   : > { %v363_v55 = vpop.f32.mrf.mxu2 }
  0xac   : > { %v456_v57 = vrot.slane %v363_v55, 4 }
  0xae   : > { %v463_v59 = vsel %vm462_vm2, %v456_v57, %v457_v54  ;;  %v2835_v57 = vmov 0.0  }
  0xaf   : > { %v465_v61 = vsel %vm464_vm4, %v461_v60, %v463_v59 }
  0xb0   : > { %v470_v63 = vadd.f32 %v465_v61, %v446_v58 }
  0xb2   : > { %v472_v1 = vadd.f32 1.0, %v470_v63 }
  0xb4   : > { %v474_v3 = vmul.f32 13.5, %v472_v1 }
  0xb6   : > { %v485_v6 = vfloor.f32 %v474_v3 }
  0xb8   : > { %v487_v8 = vsub.f32 %v474_v3, %v485_v6  ;;  %v527_v9 = vadd.f32 -1.0, %v485_v6  ;;  %v721_v10 = vmax.f32 %v485_v6, 0.0  ;;  %v911_v11 = vadd.f32 1.0, %v485_v6 }
  0xb9   : > { %v443_v12 = vpop.f32.mrf.mxu2  ;;  %v1103_v14 = vadd.f32 2.0, %v485_v6 }
  0xba   : > { %v459_v16 = vrot.slane %v443_v12, 4  ;;  %v529_v18 = vmax.f32 %v527_v9, 0.0  ;;  %v2918_v19 = vmin.f32 %v721_v10, 27.0  ;;  %v913_v20 = vmax.f32 %v911_v11, 0.0 }
  0xbb   : > { %v1105_v21 = vmax.f32 %v1103_v14, 0.0  ;;  %v489_v22 = vmul.f32 -0.5, %v487_v8  ;;  %v499_v23 = vmul.f32 1.5, %v487_v8  ;;  %v509_v24 = vmul.f32 -1.5, %v487_v8 }
  0xbc   : > { %v467_v25 = vsel %vm464_vm4, %v466_v13, %v459_v16  ;;  %v2921_v26 = vmin.f32 %v529_v18, 27.0  ;;  %v2923_v27 = vmin.f32 %v913_v20, 27.0  ;;  %v519_v28 = vmul.f32 0.5, %v487_v8 }
  0xbd   : > { %v471_v29 = vadd.f32 %v467_v25, %v447_v17  ;;  %v2925_v30 = vmin.f32 %v1105_v21, 27.0  ;;  %v491_v31 = vadd.f32 1.0, %v489_v22  ;;  %v2497_v32 = vadd.f32 -2.5, %v499_v23 }
  0xbe   : > { %v511_v33 = vadd.f32 2.0, %v509_v24  ;;  %v2499_v34 = vadd.f32 -0.5, %v519_v28  ;;  %v535_v35 = vperm.slane %v2921_v26, 1  ;;  %v727_v36 = vperm.slane %v2918_v19, 1 }
  0xbf   : > { %v473_v37 = vadd.f32 1.0, %v471_v29  ;;  %v493_v38 = vmul.f32 %v491_v31, %v487_v8  ;;  %v503_v39 = vmul.f32 %v2497_v32, %v487_v8  ;;  %v919_v40 = vperm.slane %v2923_v27, 1 }
  0xc0   : > { %v513_v41 = vmul.f32 %v511_v33, %v487_v8  ;;  %v523_v42 = vmul.f32 %v2499_v34, %v487_v8  ;;  %v2930_v43 = vperm.slane %v535_v35, 1  ;;  %v2932_v44 = vperm.slane %v727_v36, 1 }
  0xc1   : > { %v475_v45 = vmul.f32 13.5, %v473_v37  ;;  %v2495_v46 = vadd.f32 -0.5, %v493_v38  ;;  %v505_v47 = vmul.f32 %v503_v39, %v487_v8  ;;  %v2934_v48 = vperm.slane %v919_v40, 1 }
  0xc2   : > { %v515_v49 = vadd.f32 0.5, %v513_v41  ;;  %vm577_vm5 = vcmp.eq.f32.partialorder %v2911_v7, %v2930_v43  ;;  %vm769_vm6 = vcmp.eq.f32.partialorder %v2911_v7, %v2932_v44  ;;  %v2946_v54 = vmul.f32 %v523_v42, %v487_v8 }
  0xc3   : > { %v486_v51 = vfloor.f32 %v475_v45  ;;  %v2942_v52 = vmul.f32 %v2495_v46, %v487_v8  ;;  %v2944_v53 = vadd.f32 1.0, %v505_v47  ;;  %v2522_v58 = vsel %vm577_vm5, 1.0, %v2835_v57 }
  0xc4   : > { %v2948_v55 = vmul.f32 %v515_v49, %v487_v8  ;;  %vm961_vm7 = vcmp.eq.f32.partialorder %v2911_v7, %v2934_v48  ;;  %v1111_v59 = vperm.slane %v2925_v30, 1  ;;  %v2550_v0 = vsel %vm769_vm6, 1.0, %v2835_v57 }
  0xc5   : > { %v528_v60 = vadd.f32 -1.0, %v486_v51  ;;  %v722_v61 = vmax.f32 %v486_v51, 0.0  ;;  %v912_v63 = vadd.f32 1.0, %v486_v51  ;;  %v2955_v1 = vsub.f32 %v475_v45, %v486_v51 }
  0xc6   : > { %v2957_v2 = vadd.f32 2.0, %v486_v51  ;;  %v642_v3 = vperm.slane %v2942_v52, 1  ;;  %v834_v4 = vperm.slane %v2944_v53, 1  ;;  %v2578_v8 = vsel %vm961_vm7, 1.0, %v2835_v57 }
  0xc7   : > { %v530_v5 = vmax.f32 %v528_v60, 0.0  ;;  %v914_v6 = vmax.f32 %v912_v63, 0.0  ;;  %v1026_v9 = vperm.slane %v2948_v55, 1  ;;  %v2963_v10 = vmin.f32 %v722_v61, 27.0 }
  0xc8   : > { %v2965_v11 = vperm.slane %v642_v3, 1  ;;  %v2967_v12 = vperm.slane %v834_v4, 1  ;;  %v2969_v13 = vperm.slane %v1111_v59, 1  ;;  %v1106_v15 = vmax.f32 %v2957_v2, 0.0 }
  0xc9   : > { %v2971_v14 = vmin.f32 %v530_v5, 27.0  ;;  %v2974_v16 = vperm.slane %v1026_v9, 1  ;;  %v1218_v17 = vperm.slane %v2946_v54, 1  ;;  %v2977_v18 = vmin.f32 %v914_v6, 27.0 }
  0xca   : > { %v684_v20 = vmul.f32 %v2522_v58, %v2965_v11  ;;  %v876_v21 = vmul.f32 %v2550_v0, %v2967_v12  ;;  %vm1153_vm8 = vcmp.eq.f32.partialorder %v2911_v7, %v2969_v13  ;;  %v536_v25 = vperm.slane %v2921_v26, 3 }
  0xcb   : > { %v1068_v22 = vmul.f32 %v2578_v8, %v2974_v16  ;;  %v2606_v23 = vsel %vm1153_vm8, 1.0, %v2835_v57  ;;  %v2985_v24 = vperm.slane %v1218_v17, 1  ;;  %v643_v29 = vperm.slane %v2942_v52, 3 }
  0xcc   : > { %v904_v28 = vadd.f32 %v876_v21, %v684_v20  ;;  %v728_v31 = vperm.slane %v2918_v19, 3  ;;  %v835_v32 = vperm.slane %v2944_v53, 3  ;;  %v2992_v34 = vperm.slane %v536_v25, 1 }
  0xcd   : > { %v1260_v33 = vmul.f32 %v2606_v23, %v2985_v24  ;;  %v920_v35 = vperm.slane %v2923_v27, 3  ;;  %v1027_v36 = vperm.slane %v2948_v55, 3  ;;  %v2996_v38 = vperm.slane %v643_v29, 1 }
  0xce   : > { %v1096_v37 = vadd.f32 %v1068_v22, %v904_v28  ;;  %v2998_v39 = vperm.slane %v728_v31, 1  ;;  %v3000_v40 = vperm.slane %v835_v32, 1  ;;  %vm578_vm9 = vcmp.eq.f32.partialorder %v2911_v7, %v2992_v34 }
  0xcf   : > { %v3004_v41 = vperm.slane %v920_v35, 1  ;;  %v3006_v42 = vperm.slane %v1027_v36, 1  ;;  %v1112_v45 = vperm.slane %v2925_v30, 3  ;;  %v2523_v47 = vsel %vm578_vm9, 1.0, %v2835_v57 }
  0xd0   : > { %v1288_v46 = vadd.f32 %v1260_v33, %v1096_v37  ;;  %vm770_vm10 = vcmp.eq.f32.partialorder %v2911_v7, %v2998_v39  ;;  %v1219_v49 = vperm.slane %v2946_v54, 3  ;;  %v685_v51 = vmul.f32 %v2523_v47, %v2996_v38 }
  0xd1   : > { %v2551_v58 = vsel %vm770_vm10, 1.0, %v2835_v57  ;;  %vm962_vm11 = vcmp.eq.f32.partialorder %v2911_v7, %v3004_v41  ;;  %v3017_v59 = vperm.slane %v1112_v45, 1  ;;  %v537_v0 = vperm.slane %v2921_v26, 5 }
  0xd2   : > { %2725 = vmatpush.msk.msrb.mxu3 %vm464_vm4, %v1288_v46  ;;  %v877_v60 = vmul.f32 %v2551_v58, %v3000_v40  ;;  %v2579_v61 = vsel %vm962_vm11, 1.0, %v2835_v57  ;;  %v3022_v63 = vperm.slane %v1219_v49, 1  ;;  %v644_v4 = vperm.slane %v2942_v52, 5 }
  0xd3   : > { %v1069_v3 = vmul.f32 %v2579_v61, %v3006_v42  ;;  %vm1154_vm12 = vcmp.eq.f32.partialorder %v2911_v7, %v3017_v59  ;;  %v729_v5 = vperm.slane %v2918_v19, 5  ;;  %v3031_v9 = vperm.slane %v537_v0, 1 }
  0xd4   : > { %v905_v6 = vadd.f32 %v877_v60, %v685_v51  ;;  %v2607_v8 = vsel %vm1154_vm12, 1.0, %v2835_v57  ;;  %v836_v17 = vperm.slane %v2944_v53, 5  ;;  %v3035_v21 = vperm.slane %v644_v4, 1 }
  0xd5   : > { %v1261_v20 = vmul.f32 %v2607_v8, %v3022_v63  ;;  %v3037_v22 = vperm.slane %v729_v5, 1  ;;  %v921_v23 = vperm.slane %v2923_v27, 5  ;;  %vm579_vm13 = vcmp.eq.f32.partialorder %v2911_v7, %v3031_v9 }
  0xd6   : > { %v1097_v25 = vadd.f32 %v1069_v3, %v905_v6  ;;  %v3042_v28 = vperm.slane %v836_v17, 1  ;;  %v1028_v29 = vperm.slane %v2948_v55, 5  ;;  %v2524_v31 = vsel %vm579_vm13, 1.0, %v2835_v57 }
  0xd7   : > { %vm771_vm14 = vcmp.eq.f32.partialorder %v2911_v7, %v3037_v22  ;;  %v3048_v32 = vperm.slane %v921_v23, 1  ;;  %v1113_v33 = vperm.slane %v2925_v30, 5  ;;  %v686_v36 = vmul.f32 %v2524_v31, %v3035_v21 }
  0xd8   : > { %v1289_v35 = vadd.f32 %v1261_v20, %v1097_v25  ;;  %v2552_v37 = vsel %vm771_vm14, 1.0, %v2835_v57  ;;  %v3053_v45 = vperm.slane %v1028_v29, 1  ;;  %v1220_v49 = vperm.slane %v2946_v54, 5 }
  0xd9   : > { %v878_v46 = vmul.f32 %v2552_v37, %v3042_v28  ;;  %vm963_vm15 = vcmp.eq.f32.partialorder %v2911_v7, %v3048_v32  ;;  %v3058_v47 = vperm.slane %v1113_v33, 1  ;;  %vm570_vm1 = vcmp.eq.f32.partialorder %v2940_v50, %v2930_v43 }
  0xda   : > { %2730 = vmatpush.msk.msrb.mxu0 %vm464_vm4, %v1289_v35  ;;  %v2580_v51 = vsel %vm963_vm15, 1.0, %v2835_v57  ;;  %vm762_vm5 = vcmp.eq.f32.partialorder %v2940_v50, %v2932_v44  ;;  %vm954_vm6 = vcmp.eq.f32.partialorder %v2940_v50, %v2934_v48  ;;  %v3072_v61 = vperm.slane %v1220_v49, 1 }
  0xdb   : > { %v906_v58 = vadd.f32 %v878_v46, %v686_v36  ;;  %v1070_v60 = vmul.f32 %v2580_v51, %v3053_v45  ;;  %vm1155_vm7 = vcmp.eq.f32.partialorder %v2911_v7, %v3058_v47  ;;  %v2515_v3 = vsel %vm570_vm1, 1.0, %v2835_v57 }
  0xdc   : > { %v2608_v0 = vsel %vm1155_vm7, 1.0, %v2835_v57  ;;  %v2543_v4 = vsel %vm762_vm5, 1.0, %v2835_v57  ;;  %v2571_v5 = vsel %vm954_vm6, 1.0, %v2835_v57  ;;  %v677_v17 = vmul.f32 %v2515_v3, %v2965_v11 }
  0xdd   : > { %v1098_v6 = vadd.f32 %v1070_v60, %v906_v58  ;;  %v1262_v8 = vmul.f32 %v2608_v0, %v3072_v61  ;;  %v869_v20 = vmul.f32 %v2543_v4, %v2967_v12  ;;  %v1061_v23 = vmul.f32 %v2571_v5, %v2974_v16 }
  0xde   : > { %vm1146_vm8 = vcmp.eq.f32.partialorder %v2940_v50, %v2969_v13  ;;  %vm571_vm9 = vcmp.eq.f32.partialorder %v2940_v50, %v2992_v34  ;;  %vm763_vm10 = vcmp.eq.f32.partialorder %v2940_v50, %v2998_v39  ;;  %vm955_vm11 = vcmp.eq.f32.partialorder %v2940_v50, %v3004_v41 }
  0xdf   : > { %v1290_v25 = vadd.f32 %v1262_v8, %v1098_v6  ;;  %v897_v29 = vadd.f32 %v869_v20, %v677_v17  ;;  %v2599_v31 = vsel %vm1146_vm8, 1.0, %v2835_v57  ;;  %v2516_v33 = vsel %vm571_vm9, 1.0, %v2835_v57 }
  0xe0   : > { %v1253_v35 = vmul.f32 %v2599_v31, %v2985_v24  ;;  %v678_v36 = vmul.f32 %v2516_v33, %v2996_v38  ;;  %v2544_v37 = vsel %vm763_vm10, 1.0, %v2835_v57  ;;  %v2572_v51 = vsel %vm955_vm11, 1.0, %v2835_v57 }
  0xe1   : > { %2735 = vmatpush.msk.msra.mxu1 %vm464_vm4, %v1290_v25  ;;  %2763 = vmatpush.msk.msrb.mxu2 %vm464_vm4, %v1290_v25  ;;  %v1089_v46 = vadd.f32 %v1061_v23, %v897_v29  ;;  %v870_v49 = vmul.f32 %v2544_v37, %v3000_v40  ;;  %vm1147_vm12 = vcmp.eq.f32.partialorder %v2940_v50, %v3017_v59  ;;  %v3103_v58 = vmin.f32 %v1106_v15, 27.0 }
  0xe2   : > { %v1062_v60 = vmul.f32 %v2572_v51, %v3006_v42  ;;  %vm572_vm13 = vcmp.eq.f32.partialorder %v2940_v50, %v3031_v9  ;;  %vm764_vm14 = vcmp.eq.f32.partialorder %v2940_v50, %v3037_v22  ;;  %v2600_v4 = vsel %vm1147_vm12, 1.0, %v2835_v57 }
  0xe3   : > { %v1281_v0 = vadd.f32 %v1253_v35, %v1089_v46  ;;  %v898_v3 = vadd.f32 %v870_v49, %v678_v36  ;;  %v2517_v5 = vsel %vm572_vm13, 1.0, %v2835_v57  ;;  %v2545_v2 = vsel %vm764_vm14, 1.0, %v2835_v57 }
  0xe4   : > { %v679_v6 = vmul.f32 %v2517_v5, %v3035_v21  ;;  %vm956_vm15 = vcmp.eq.f32.partialorder %v2940_v50, %v3048_v32  ;;  %vm1148_vm1 = vcmp.eq.f32.partialorder %v2940_v50, %v3058_v47  ;;  %v1254_v8 = vmul.f32 %v2600_v4, %v3022_v63 }
  0xe5   : > { %2074 = vmatpush.msrb.mxu3 %v1281_v0  ;;  %v1090_v15 = vadd.f32 %v1062_v60, %v898_v3  ;;  %v871_v17 = vmul.f32 %v2545_v2, %v3042_v28  ;;  %v2573_v20 = vsel %vm956_vm15, 1.0, %v2835_v57  ;;  %v2601_v25 = vsel %vm1148_vm1, 1.0, %v2835_v57 }
  0xe6   : > { %v1063_v23 = vmul.f32 %v2573_v20, %v3053_v45  ;;  %v478_v29 = vadd.s32 8, %v2908_v62  ;;  %v3125_v31 = vcvt.s32.f32 %v2908_v62  ;;  %v1255_v36 = vmul.f32 %v2601_v25, %v3072_v61 }
  0xe7   : > { %v1282_v33 = vadd.f32 %v1254_v8, %v1090_v15  ;;  %v899_v35 = vadd.f32 %v871_v17, %v679_v6  ;;  %v538_v37 = vperm.slane %v2921_v26, 7 }
  0xe8   : > { %v3129_v46 = vcvt.s32.f32 %v478_v29  ;;  %vm556_vm5 = vcmp.eq.f32.partialorder %v3125_v31, %v2930_v43  ;;  %vm748_vm6 = vcmp.eq.f32.partialorder %v3125_v31, %v2932_v44  ;;  %vm940_vm7 = vcmp.eq.f32.partialorder %v3125_v31, %v2934_v48 }
  0xe9   : > { %2103 = vmatpush.msrb.mxu0 %v1282_v33  ;;  %v1091_v62 = vadd.f32 %v1063_v23, %v899_v35  ;;  %v2501_v49 = vsel %vm556_vm5, 1.0, %v2835_v57  ;;  %v2529_v51 = vsel %vm748_vm6, 1.0, %v2835_v57  ;;  %v2557_v60 = vsel %vm940_vm7, 1.0, %v2835_v57 }
  0xea   : > { %vm563_vm8 = vcmp.eq.f32.partialorder %v3129_v46, %v2930_v43  ;;  %vm755_vm9 = vcmp.eq.f32.partialorder %v3129_v46, %v2932_v44  ;;  %vm947_vm10 = vcmp.eq.f32.partialorder %v3129_v46, %v2934_v48  ;;  %vm1139_vm11 = vcmp.eq.f32.partialorder %v3129_v46, %v2969_v13 }
  0xeb   : > { %v1283_v0 = vadd.f32 %v1255_v36, %v1091_v62  ;;  %v2508_v3 = vsel %vm563_vm8, 1.0, %v2835_v57  ;;  %v2536_v4 = vsel %vm755_vm9, 1.0, %v2835_v57  ;;  %v2564_v5 = vsel %vm947_vm10, 1.0, %v2835_v57 }
  0xec   : > { %v670_v6 = vmul.f32 %v2508_v3, %v2965_v11  ;;  %v862_v43 = vmul.f32 %v2536_v4, %v2967_v12  ;;  %v1054_v2 = vmul.f32 %v2564_v5, %v2974_v16  ;;  %v2592_v44 = vsel %vm1139_vm11, 1.0, %v2835_v57 }
  0xed   : > { %2132 = vmatpush.msra.mxu1 %v1283_v0  ;;  %2764 = vmatpush.msrb.mxu2 %v1283_v0  ;;  %v1246_v48 = vmul.f32 %v2592_v44, %v2985_v24  ;;  %vm564_vm12 = vcmp.eq.f32.partialorder %v3129_v46, %v2992_v34  ;;  %vm756_vm13 = vcmp.eq.f32.partialorder %v3129_v46, %v2998_v39  ;;  %v3160_v15 = vperm.slane %v538_v37, 1 }
  0xee   : > { %v890_v8 = vadd.f32 %v862_v43, %v670_v6  ;;  %v2509_v17 = vsel %vm564_vm12, 1.0, %v2835_v57  ;;  %v2537_v20 = vsel %vm756_vm13, 1.0, %v2835_v57  ;;  %vm948_vm14 = vcmp.eq.f32.partialorder %v3129_v46, %v3004_v41 }
  0xef   : > { %v671_v23 = vmul.f32 %v2509_v17, %v2996_v38  ;;  %v863_v25 = vmul.f32 %v2537_v20, %v3000_v40  ;;  %v2565_v29 = vsel %vm948_vm14, 1.0, %v2835_v57  ;;  %vm1140_vm15 = vcmp.eq.f32.partialorder %v3129_v46, %v3017_v59 }
  0xf0   : > { %v1082_v33 = vadd.f32 %v1054_v2, %v890_v8  ;;  %v1055_v35 = vmul.f32 %v2565_v29, %v3006_v42  ;;  %v2593_v36 = vsel %vm1140_vm15, 1.0, %v2835_v57  ;;  %vm565_vm1 = vcmp.eq.f32.partialorder %v3129_v46, %v3031_v9 }
  0xf1   : > { %v891_v37 = vadd.f32 %v863_v25, %v671_v23  ;;  %v1247_v62 = vmul.f32 %v2593_v36, %v3022_v63  ;;  %v2510_v0 = vsel %vm565_vm1, 1.0, %v2835_v57  ;;  %vm757_vm5 = vcmp.eq.f32.partialorder %v3129_v46, %v3037_v22 }
  0xf2   : > { %v1274_v3 = vadd.f32 %v1246_v48, %v1082_v33  ;;  %v672_v4 = vmul.f32 %v2510_v0, %v3035_v21  ;;  %v2538_v5 = vsel %vm757_vm5, 1.0, %v2835_v57  ;;  %vm949_vm6 = vcmp.eq.f32.partialorder %v3129_v46, %v3048_v32 }
  0xf3   : > { %vm2027_vm7 = vcmask 228352   ;;  %v1083_v6 = vadd.f32 %v1055_v35, %v891_v37  ;;  %v864_v43 = vmul.f32 %v2538_v5, %v3042_v28  ;;  %v2566_v2 = vsel %vm949_vm6, 1.0, %v2835_v57 }
  0xf4   : > { %vm1141_vm8 = vcmp.eq.f32.partialorder %v3129_v46, %v3058_v47  ;;  %2075 = vmatpush.msrb.mxu3 %v1274_v3  ;;  %v1056_v44 = vmul.f32 %v2566_v2, %v3053_v45  ;;  %v663_v8 = vmul.f32 %v2501_v49, %v2965_v11  ;;  %v855_v17 = vmul.f32 %v2529_v51, %v2967_v12 }
  0xf5   : > { %v2594_v48 = vsel %vm1141_vm8, 1.0, %v2835_v57  ;;  %v1275_v20 = vadd.f32 %v1247_v62, %v1083_v6  ;;  %v892_v23 = vadd.f32 %v864_v43, %v672_v4  ;;  %v1047_v29 = vmul.f32 %v2557_v60, %v2974_v16  ;;  %v3220_v62 = vld [vmem:[%s3206_s9] sm:$0xff] }
  0xf6   : > { %v1248_v25 = vmul.f32 %v2594_v48, %v3072_v61  ;;  %v883_v33 = vadd.f32 %v855_v17, %v663_v8  ;;  %vm1132_vm9 = vcmp.eq.f32.partialorder %v3125_v31, %v2969_v13  ;;  %vm557_vm10 = vcmp.eq.f32.partialorder %v3125_v31, %v2992_v34 }
  0xf7   : > { %vm749_vm11 = vcmp.eq.f32.partialorder %v3125_v31, %v2998_v39  ;;  %2104 = vmatpush.msrb.mxu0 %v1275_v20  ;;  %v1084_v11 = vadd.f32 %v1056_v44, %v892_v23  ;;  %v2585_v12 = vsel %vm1132_vm9, 1.0, %v2835_v57  ;;  %v2502_v49 = vsel %vm557_vm10, 1.0, %v2835_v57 }
  0xf8   : > { %v2530_v51 = vsel %vm749_vm11, 1.0, %v2835_v57  ;;  %v1075_v13 = vadd.f32 %v1047_v29, %v883_v33  ;;  %v1239_v16 = vmul.f32 %v2585_v12, %v2985_v24  ;;  %v664_v34 = vmul.f32 %v2502_v49, %v2996_v38  ;;  %v3264_v33 = vld [vmem:[%s3206_s9 + $0x18] sm:$0xf] }
  0xf9   : > { %v856_v39 = vmul.f32 %v2530_v51, %v3000_v40  ;;  %v1276_v60 = vadd.f32 %v1248_v25, %v1084_v11  ;;  %vm941_vm12 = vcmp.eq.f32.partialorder %v3125_v31, %v3004_v41  ;;  %vm1133_vm13 = vcmp.eq.f32.partialorder %v3125_v31, %v3017_v59 }
  0xfa   : > { %vm558_vm14 = vcmp.eq.f32.partialorder %v3125_v31, %v3031_v9  ;;  %v1267_v35 = vadd.f32 %v1239_v16, %v1075_v13  ;;  %v2558_v37 = vsel %vm941_vm12, 1.0, %v2835_v57  ;;  %v2586_v24 = vsel %vm1133_vm13, 1.0, %v2835_v57 }
  0xfb   : > { %v884_v36 = vadd.f32 %v856_v39, %v664_v34  ;;  %2133 = vmatpush.msra.mxu1 %v1276_v60  ;;  %2765 = vmatpush.msrb.mxu2 %v1276_v60  ;;  %v1048_v38 = vmul.f32 %v2558_v37, %v3006_v42  ;;  %v1240_v40 = vmul.f32 %v2586_v24, %v3022_v63  ;;  %v2503_v41 = vsel %vm558_vm14, 1.0, %v2835_v57 }
  0xfc   : > { %vm750_vm15 = vcmp.eq.f32.partialorder %v3125_v31, %v3037_v22  ;;  %2076 = vmatpush.msrb.mxu3 %v1267_v35  ;;  %v665_v59 = vmul.f32 %v2503_v41, %v3035_v21  ;;  %vm942_vm1 = vcmp.eq.f32.partialorder %v3125_v31, %v3048_v32  ;;  %vm1134_vm5 = vcmp.eq.f32.partialorder %v3125_v31, %v3058_v47 }
  0xfd   : > { %v2531_v9 = vsel %vm750_vm15, 1.0, %v2835_v57  ;;  %v1076_v0 = vadd.f32 %v1048_v38, %v884_v36  ;;  %v2559_v63 = vsel %vm942_vm1, 1.0, %v2835_v57  ;;  %v2587_v3 = vsel %vm1134_vm5, 1.0, %v2835_v57  ;;  %2726 = vmatmul.msk.f32.vlgmr.msrb.gmra.mxu3 %vm2027_vm7, %v3220_v62 }
  0xfe   : > { %v857_v42 = vmul.f32 %v2531_v9, %v3042_v28  ;;  %v1049_v21 = vmul.f32 %v2559_v63, %v3053_v45  ;;  %v1241_v22 = vmul.f32 %v2587_v3, %v3072_v61  ;;  %vm580_vm6 = vcmp.eq.f32.partialorder %v2911_v7, %v3160_v15 }
  0xff   : > { %v645_v32 = vperm.slane %v2942_v52, 7  ;;  %v1268_v47 = vadd.f32 %v1240_v40, %v1076_v0  ;;  %v2525_v28 = vsel %vm580_vm6, 1.0, %v2835_v57  ;;  %v730_v5 = vperm.slane %v2918_v19, 7 }
 0x100   : > { %v885_v4 = vadd.f32 %v857_v42, %v665_v59  ;;  %v837_v43 = vperm.slane %v2944_v53, 7  ;;  %v922_v45 = vperm.slane %v2923_v27, 7  ;;  %v1029_v61 = vperm.slane %v2948_v55, 7 }
 0x101   : > { %v3245_v6 = vperm.slane %v645_v32, 1  ;;  %2105 = vmatpush.msrb.mxu0 %v1268_v47  ;;  %v3250_v44 = vperm.slane %v730_v5, 1  ;;  %v1114_v48 = vperm.slane %v2925_v30, 7  ;;  %v1221_v8 = vperm.slane %v2946_v54, 7 }
 0x102   : > { %v1077_v2 = vadd.f32 %v1049_v21, %v885_v4  ;;  %2731 = vmatmul.msk.f32.vlgmr.msrb.gmra.mxu0 %vm2027_vm7, %v3220_v62  ;;  %v3257_v20 = vperm.slane %v837_v43, 1  ;;  %v3259_v23 = vperm.slane %v922_v45, 1  ;;  %v3261_v25 = vperm.slane %v1029_v61, 1 }
 0x103   : > { %v687_v17 = vmul.f32 %v2525_v28, %v3245_v6  ;;  %vm772_vm8 = vcmp.eq.f32.partialorder %v2911_v7, %v3250_v44  ;;  %v3268_v11 = vperm.slane %v1114_v48, 1  ;;  %v3270_v12 = vperm.slane %v1221_v8, 1 }
 0x104   : > { %v1269_v29 = vadd.f32 %v1241_v22, %v1077_v2  ;;  %v2553_v49 = vsel %vm772_vm8, 1.0, %v2835_v57  ;;  %vm964_vm9 = vcmp.eq.f32.partialorder %v2911_v7, %v3259_v23  ;;  %vm573_vm10 = vcmp.eq.f32.partialorder %v2940_v50, %v3160_v15 }
 0x105   : > { %vm765_vm11 = vcmp.eq.f32.partialorder %v2940_v50, %v3250_v44  ;;  %v879_v51 = vmul.f32 %v2553_v49, %v3257_v20  ;;  %v2581_v13 = vsel %vm964_vm9, 1.0, %v2835_v57  ;;  %vm1156_vm12 = vcmp.eq.f32.partialorder %v2911_v7, %v3268_v11 }
 0x106   : > { %2134 = vmatpush.msra.mxu1 %v1269_v29  ;;  %2766 = vmatpush.msrb.mxu2 %v1269_v29  ;;  %v2518_v16 = vsel %vm573_vm10, 1.0, %v2835_v57  ;;  %v1071_v34 = vmul.f32 %v2581_v13, %v3261_v25  ;;  %v2609_v39 = vsel %vm1156_vm12, 1.0, %v2835_v57  ;;  %v2546_v35 = vsel %vm765_vm11, 1.0, %v2835_v57 }
 0x107   : > { %2736 = vmatmul.msk.f32.vlgmr.msra.gmra.mxu1 %vm2027_vm7, %v3220_v62  ;;  %2739 = vmatmul.msk.f32.vlgmr.msrb.gmra.mxu2 %vm2027_vm7, %v3264_v33  ;;  %v680_v60 = vmul.f32 %v2518_v16, %v3245_v6  ;;  %v907_v36 = vadd.f32 %v879_v51, %v687_v17  ;;  %v1263_v37 = vmul.f32 %v2609_v39, %v3270_v12  ;;  %v490_v4 = vmul.f32 -0.5, %v2955_v1 }
 0x108   : > { %v872_v24 = vmul.f32 %v2546_v35, %v3257_v20  ;;  %vm957_vm13 = vcmp.eq.f32.partialorder %v2940_v50, %v3259_v23  ;;  %vm1149_vm14 = vcmp.eq.f32.partialorder %v2940_v50, %v3268_v11  ;;  %vm566_vm15 = vcmp.eq.f32.partialorder %v3129_v46, %v3160_v15 }
 0x109   : > { %v2574_v38 = vsel %vm957_vm13, 1.0, %v2835_v57  ;;  %vm758_vm1 = vcmp.eq.f32.partialorder %v3129_v46, %v3250_v44  ;;  %v1099_v40 = vadd.f32 %v1071_v34, %v907_v36  ;;  %v2602_v9 = vsel %vm1149_vm14, 1.0, %v2835_v57 }
 0x10a   : > { %v900_v41 = vadd.f32 %v872_v24, %v680_v60  ;;  %v1064_v59 = vmul.f32 %v2574_v38, %v3261_v25  ;;  %v1256_v0 = vmul.f32 %v2602_v9, %v3270_v12  ;;  %v2511_v42 = vsel %vm566_vm15, 1.0, %v2835_v57 }
 0x10b   : > { %v2539_v63 = vsel %vm758_vm1, 1.0, %v2835_v57  ;;  %vm950_vm5 = vcmp.eq.f32.partialorder %v3129_v46, %v3259_v23  ;;  %v1291_v3 = vadd.f32 %v1263_v37, %v1099_v40  ;;  %v673_v22 = vmul.f32 %v2511_v42, %v3245_v6 }
 0x10c   : > { %v1092_v21 = vadd.f32 %v1064_v59, %v900_v41  ;;  %v865_v32 = vmul.f32 %v2539_v63, %v3257_v20  ;;  %v2567_v47 = vsel %vm950_vm5, 1.0, %v2835_v57  ;;  %vm1142_vm6 = vcmp.eq.f32.partialorder %v3129_v46, %v3268_v11 }
 0x10d   : > { %v500_v28 = vmul.f32 1.5, %v2955_v1  ;;  %2740 = vmatpush.msk.msra.mxu2 %vm464_vm4, %v1291_v3  ;;  %v1057_v45 = vmul.f32 %v2567_v47, %v3261_v25  ;;  %v2595_v61 = vsel %vm1142_vm6, 1.0, %v2835_v57  ;;  %v492_v48 = vadd.f32 1.0, %v490_v4 }
 0x10e   : > { %v1284_v5 = vadd.f32 %v1256_v0, %v1092_v21  ;;  %v893_v43 = vadd.f32 %v865_v32, %v673_v22  ;;  %v1249_v2 = vmul.f32 %v2595_v61, %v3270_v12  ;;  %v510_v17 = vmul.f32 -1.5, %v2955_v1 }
 0x10f   : > { %v2498_v8 = vadd.f32 -2.5, %v500_v28  ;;  %v520_v49 = vmul.f32 0.5, %v2955_v1  ;;  %v539_v51 = vperm.slane %v2971_v14, 1  ;;  %v731_v13 = vperm.slane %v2963_v10, 1 }
 0x110   : > { %2161 = vmatpush.msra.mxu2 %v1284_v5  ;;  %v1085_v29 = vadd.f32 %v1057_v45, %v893_v43  ;;  %v494_v16 = vmul.f32 %v492_v48, %v2955_v1  ;;  %v512_v39 = vadd.f32 2.0, %v510_v17  ;;  %v923_v60 = vperm.slane %v2977_v18, 1 }
 0x111   : > { %v504_v34 = vmul.f32 %v2498_v8, %v2955_v1  ;;  %v2500_v36 = vadd.f32 -0.5, %v520_v49  ;;  %v3328_v37 = vperm.slane %v539_v51, 1  ;;  %v3330_v24 = vperm.slane %v731_v13, 1 }
 0x112   : > { %v1277_v35 = vadd.f32 %v1249_v2, %v1085_v29  ;;  %v2496_v38 = vadd.f32 -0.5, %v494_v16  ;;  %v514_v41 = vmul.f32 %v512_v39, %v2955_v1  ;;  %v3334_v59 = vperm.slane %v923_v60, 1 }
 0x113   : > { %v506_v40 = vmul.f32 %v504_v34, %v2955_v1  ;;  %v524_v9 = vmul.f32 %v2500_v36, %v2955_v1  ;;  %vm581_vm8 = vcmp.eq.f32.partialorder %v2911_v7, %v3328_v37  ;;  %vm773_vm9 = vcmp.eq.f32.partialorder %v2911_v7, %v3330_v24 }
 0x114   : > { %2162 = vmatpush.msra.mxu2 %v1277_v35  ;;  %v1115_v0 = vperm.slane %v3103_v58, 1  ;;  %v3343_v42 = vmul.f32 %v2496_v38, %v2955_v1  ;;  %v516_v3 = vadd.f32 0.5, %v514_v41  ;;  %v2526_v21 = vsel %vm581_vm8, 1.0, %v2835_v57 }
 0x115   : > { %v3345_v63 = vadd.f32 1.0, %v506_v40  ;;  %v3349_v22 = vmul.f32 %v524_v9, %v2955_v1  ;;  %v2554_v32 = vsel %vm773_vm9, 1.0, %v2835_v57  ;;  %vm965_vm10 = vcmp.eq.f32.partialorder %v2911_v7, %v3334_v59 }
 0x116   : > { %v3354_v47 = vperm.slane %v1115_v0, 1  ;;  %v3357_v4 = vmul.f32 %v516_v3, %v2955_v1  ;;  %v646_v28 = vperm.slane %v3343_v42, 1  ;;  %v2582_v43 = vsel %vm965_vm10, 1.0, %v2835_v57 }
 0x117   : > { %4467 = vst [vmem:[#allocation5_spill] sm:$0xff] %v3345_v63  ;;  %v838_v5 = vperm.slane %v3345_v63, 1  ;;  %v1222_v45 = vperm.slane %v3349_v22, 1  ;;  %v540_v61 = vperm.slane %v2971_v14, 3  ;;  %v647_v2 = vperm.slane %v3343_v42, 3 }
 0x118   : > { %4468 = vst [vmem:[#allocation6_spill] sm:$0xff] %v3349_v22  ;;  %vm1157_vm11 = vcmp.eq.f32.partialorder %v2911_v7, %v3354_v47  ;;  %v3367_v48 = vperm.slane %v646_v28, 1  ;;  %v1030_v1 = vperm.slane %v3357_v4, 1  ;;  %v732_v13 = vperm.slane %v2963_v10, 3 }
 0x119   : > { %4469 = vst [vmem:[#allocation7_spill] sm:$0xff] %v3357_v4  ;;  %v3369_v8 = vperm.slane %v838_v5, 1  ;;  %v2610_v17 = vsel %vm1157_vm11, 1.0, %v2835_v57  ;;  %v3373_v29 = vperm.slane %v1222_v45, 1  ;;  %v3375_v49 = vperm.slane %v540_v61, 1  ;;  %v3405_v61 = vld [vmem:[%s3206_s9 + $0x8] sm:$0xff] }
 0x11a   : > { %v3377_v51 = vperm.slane %v647_v2, 1  ;;  %v688_v16 = vmul.f32 %v2526_v21, %v3367_v48  ;;  %v3382_v39 = vperm.slane %v1030_v1, 1  ;;  %v839_v60 = vperm.slane %v3345_v63, 3  ;;  %2727 = vmatmul.msk.f32.gmra.mxu3 %vm2027_vm7, %v3405_v61  ;;  %2732 = vmatmul.msk.f32.gmra.mxu0 %vm2027_vm7, %v3405_v61 }
 0x11b   : > { %v880_v34 = vmul.f32 %v2554_v32, %v3369_v8  ;;  %v1264_v35 = vmul.f32 %v2610_v17, %v3373_v29  ;;  %vm582_vm12 = vcmp.eq.f32.partialorder %v2911_v7, %v3375_v49  ;;  %v3388_v36 = vperm.slane %v732_v13, 1  ;;  %2737 = vmatmul.msk.f32.gmra.mxu1 %vm2027_vm7, %v3405_v61 }
 0x11c   : > { %v924_v38 = vperm.slane %v2977_v18, 3  ;;  %v1072_v41 = vmul.f32 %v2582_v43, %v3382_v39  ;;  %v2527_v9 = vsel %vm582_vm12, 1.0, %v2835_v57  ;;  %v3393_v0 = vperm.slane %v839_v60, 1 }
 0x11d   : > { %v908_v40 = vadd.f32 %v880_v34, %v688_v16  ;;  %v689_v3 = vmul.f32 %v2527_v9, %v3377_v51  ;;  %vm774_vm13 = vcmp.eq.f32.partialorder %v2911_v7, %v3388_v36  ;;  %v1031_v32 = vperm.slane %v3357_v4, 3 }
 0x11e   : > { %v3398_v21 = vperm.slane %v924_v38, 1  ;;  %v2555_v5 = vsel %vm774_vm13, 1.0, %v2835_v57  ;;  %v1116_v45 = vperm.slane %v3103_v58, 3  ;;  %v1223_v43 = vperm.slane %v3349_v22, 3 }
 0x11f   : > { %v1100_v28 = vadd.f32 %v1072_v41, %v908_v40  ;;  %v881_v2 = vmul.f32 %v2555_v5, %v3393_v0  ;;  %v3410_v1 = vperm.slane %v1031_v32, 1  ;;  %v541_v17 = vperm.slane %v2971_v14, 5 }
 0x120   : > { %vm966_vm14 = vcmp.eq.f32.partialorder %v2911_v7, %v3398_v21  ;;  %v3418_v34 = vperm.slane %v1116_v45, 1  ;;  %v3420_v60 = vperm.slane %v1223_v43, 1  ;;  %v648_v9 = vperm.slane %v3343_v42, 5 }
 0x121   : > { %v1292_v13 = vadd.f32 %v1264_v35, %v1100_v28  ;;  %v2583_v16 = vsel %vm966_vm14, 1.0, %v2835_v57  ;;  %v909_v38 = vadd.f32 %v881_v2, %v689_v3  ;;  %v3425_v41 = vperm.slane %v541_v17, 1 }
 0x122   : > { %v1073_v40 = vmul.f32 %v2583_v16, %v3410_v1  ;;  %vm1158_vm15 = vcmp.eq.f32.partialorder %v2911_v7, %v3418_v34  ;;  %v733_v35 = vperm.slane %v2963_v10, 5  ;;  %v840_v32 = vperm.slane %v3345_v63, 5 }
 0x123   : > { %2745 = vmatpush.msk.msra.mxu3 %vm464_vm4, %v1292_v13  ;;  %v925_v28 = vperm.slane %v2977_v18, 5  ;;  %v2611_v3 = vsel %vm1158_vm15, 1.0, %v2835_v57  ;;  %vm583_vm1 = vcmp.eq.f32.partialorder %v2911_v7, %v3425_v41  ;;  %v3437_v45 = vperm.slane %v648_v9, 1 }
 0x124   : > { %v1101_v5 = vadd.f32 %v1073_v40, %v909_v38  ;;  %v1265_v43 = vmul.f32 %v2611_v3, %v3420_v60  ;;  %v2528_v2 = vsel %vm583_vm1, 1.0, %v2835_v57  ;;  %v3441_v17 = vperm.slane %v733_v35, 1 }
 0x125   : > { %v3443_v13 = vperm.slane %v840_v32, 1  ;;  %v690_v16 = vmul.f32 %v2528_v2, %v3437_v45  ;;  %v3446_v56 = vperm.slane %v925_v28, 1  ;;  %v1032_v38 = vperm.slane %v3357_v4, 5 }
 0x126   : > { %v1117_v40 = vperm.slane %v3103_v58, 5  ;;  %v1293_v63 = vadd.f32 %v1265_v43, %v1101_v5  ;;  %vm775_vm5 = vcmp.eq.f32.partialorder %v2911_v7, %v3441_v17  ;;  %v1224_v9 = vperm.slane %v3349_v22, 5 }
 0x127   : > { %vm559_vm6 = vcmp.eq.f32.partialorder %v3125_v31, %v3160_v15  ;;  %v2556_v35 = vsel %vm775_vm5, 1.0, %v2835_v57  ;;  %vm967_vm8 = vcmp.eq.f32.partialorder %v2911_v7, %v3446_v56  ;;  %v3458_v32 = vperm.slane %v1032_v38, 1 }
 0x128   : > { %v3460_v28 = vperm.slane %v1117_v40, 1  ;;  %2750 = vmatpush.msk.msra.mxu0 %vm464_vm4, %v1293_v63  ;;  %v882_v5 = vmul.f32 %v2556_v35, %v3443_v13  ;;  %v2584_v3 = vsel %vm967_vm8, 1.0, %v2835_v57  ;;  %v3465_v43 = vperm.slane %v1224_v9, 1 }
 0x129   : > { %v2504_v2 = vsel %vm559_vm6, 1.0, %v2835_v57  ;;  %v1074_v15 = vmul.f32 %v2584_v3, %v3458_v32  ;;  %vm751_vm10 = vcmp.eq.f32.partialorder %v3125_v31, %v3250_v44  ;;  %vm943_vm11 = vcmp.eq.f32.partialorder %v3125_v31, %v3259_v23 }
 0x12a   : > { %vm1159_vm9 = vcmp.eq.f32.partialorder %v2911_v7, %v3460_v28  ;;  %v666_v38 = vmul.f32 %v2504_v2, %v3245_v6  ;;  %v910_v40 = vadd.f32 %v882_v5, %v690_v16  ;;  %v2532_v35 = vsel %vm751_vm10, 1.0, %v2835_v57 }
 0x12b   : > { %v2612_v63 = vsel %vm1159_vm9, 1.0, %v2835_v57  ;;  %v858_v3 = vmul.f32 %v2532_v35, %v3257_v20  ;;  %v2560_v22 = vsel %vm943_vm11, 1.0, %v2835_v57  ;;  %vm1135_vm12 = vcmp.eq.f32.partialorder %v3125_v31, %v3268_v11 }
 0x12c   : > { %v1266_v9 = vmul.f32 %v2612_v63, %v3465_v43  ;;  %v1102_v6 = vadd.f32 %v1074_v15, %v910_v40  ;;  %v1050_v44 = vmul.f32 %v2560_v22, %v3261_v25  ;;  %v2588_v16 = vsel %vm1135_vm12, 1.0, %v2835_v57 }
 0x12d   : > { %vm574_vm13 = vcmp.eq.f32.partialorder %v2940_v50, %v3328_v37  ;;  %v886_v5 = vadd.f32 %v858_v3, %v666_v38  ;;  %v1242_v23 = vmul.f32 %v2588_v16, %v3270_v12  ;;  %vm766_vm14 = vcmp.eq.f32.partialorder %v2940_v50, %v3330_v24 }
 0x12e   : > { %v2519_v2 = vsel %vm574_vm13, 1.0, %v2835_v57  ;;  %v1294_v20 = vadd.f32 %v1266_v9, %v1102_v6  ;;  %v2547_v11 = vsel %vm766_vm14, 1.0, %v2835_v57  ;;  %vm958_vm15 = vcmp.eq.f32.partialorder %v2940_v50, %v3334_v59 }
 0x12f   : > { %v681_v63 = vmul.f32 %v2519_v2, %v3367_v48  ;;  %v1078_v25 = vadd.f32 %v1050_v44, %v886_v5  ;;  %v873_v22 = vmul.f32 %v2547_v11, %v3369_v8  ;;  %v2575_v15 = vsel %vm958_vm15, 1.0, %v2835_v57 }
 0x130   : > { %vm1150_vm1 = vcmp.eq.f32.partialorder %v2940_v50, %v3354_v47  ;;  %2755 = vmatpush.msk.msrb.mxu1 %vm464_vm4, %v1294_v20  ;;  %v1065_v12 = vmul.f32 %v2575_v15, %v3382_v39  ;;  %vm575_vm5 = vcmp.eq.f32.partialorder %v2940_v50, %v3375_v49  ;;  %vm767_vm6 = vcmp.eq.f32.partialorder %v2940_v50, %v3388_v36 }
 0x131   : > { %v2603_v38 = vsel %vm1150_vm1, 1.0, %v2835_v57  ;;  %v1270_v40 = vadd.f32 %v1242_v23, %v1078_v25  ;;  %v901_v35 = vadd.f32 %v873_v22, %v681_v63  ;;  %v2520_v3 = vsel %vm575_vm5, 1.0, %v2835_v57 }
 0x132   : > { %v1257_v9 = vmul.f32 %v2603_v38, %v3373_v29  ;;  %v682_v6 = vmul.f32 %v2520_v3, %v3377_v51  ;;  %v2548_v44 = vsel %vm767_vm6, 1.0, %v2835_v57  ;;  %vm959_vm8 = vcmp.eq.f32.partialorder %v2940_v50, %v3398_v21 }
 0x133   : > { %vm1151_vm9 = vcmp.eq.f32.partialorder %v2940_v50, %v3418_v34  ;;  %2163 = vmatpush.msra.mxu2 %v1270_v40  ;;  %v1093_v16 = vadd.f32 %v1065_v12, %v901_v35  ;;  %v874_v5 = vmul.f32 %v2548_v44, %v3393_v0  ;;  %v2576_v23 = vsel %vm959_vm8, 1.0, %v2835_v57  ;;  %v3528_v12 = vld [vmem:[%s3206_s9 + $0x10] sm:$0xff] }
 0x134   : > { %v2604_v2 = vsel %vm1151_vm9, 1.0, %v2835_v57  ;;  %v1066_v20 = vmul.f32 %v2576_v23, %v3410_v1  ;;  %vm576_vm10 = vcmp.eq.f32.partialorder %v2940_v50, %v3425_v41  ;;  %vm768_vm11 = vcmp.eq.f32.partialorder %v2940_v50, %v3441_v17  ;;  %2741 = vmatmul.msk.f32.vlgmr.msra.gmra.mxu2 %vm2027_vm7, %v3220_v62  ;;  %2728 = vmatmul.msk.f32.gmra.mxu3 %vm2027_vm7, %v3528_v12 }
 0x135   : > { %v1258_v63 = vmul.f32 %v2604_v2, %v3420_v60  ;;  %v1285_v11 = vadd.f32 %v1257_v9, %v1093_v16  ;;  %v902_v25 = vadd.f32 %v874_v5, %v682_v6  ;;  %v2521_v22 = vsel %vm576_vm10, 1.0, %v2835_v57  ;;  %2733 = vmatmul.msk.f32.gmra.mxu0 %vm2027_vm7, %v3528_v12  ;;  %2738 = vmatmul.msk.f32.gmra.mxu1 %vm2027_vm7, %v3528_v12 }
 0x136   : > { %v2549_v15 = vsel %vm768_vm11, 1.0, %v2835_v57  ;;  %v683_v38 = vmul.f32 %v2521_v22, %v3437_v45  ;;  %vm960_vm12 = vcmp.eq.f32.partialorder %v2940_v50, %v3446_v56  ;;  %vm1152_vm13 = vcmp.eq.f32.partialorder %v2940_v50, %v3460_v28 }
 0x137   : > { %v875_v40 = vmul.f32 %v2549_v15, %v3443_v13  ;;  %2190 = vmatpush.msra.mxu3 %v1285_v11  ;;  %v1094_v35 = vadd.f32 %v1066_v20, %v902_v25  ;;  %v2577_v9 = vsel %vm960_vm12, 1.0, %v2835_v57  ;;  %v2605_v3 = vsel %vm1152_vm13, 1.0, %v2835_v57 }
 0x138   : > { %vm567_vm14 = vcmp.eq.f32.partialorder %v3129_v46, %v3328_v37  ;;  %v1067_v44 = vmul.f32 %v2577_v9, %v3458_v32  ;;  %v1259_v16 = vmul.f32 %v2605_v3, %v3465_v43  ;;  %vm759_vm15 = vcmp.eq.f32.partialorder %v3129_v46, %v3330_v24 }
 0x139   : > { %v903_v6 = vadd.f32 %v875_v40, %v683_v38  ;;  %v2512_v5 = vsel %vm567_vm14, 1.0, %v2835_v57  ;;  %v1286_v23 = vadd.f32 %v1258_v63, %v1094_v35  ;;  %vm951_vm1 = vcmp.eq.f32.partialorder %v3129_v46, %v3334_v59 }
 0x13a   : > { %v674_v2 = vmul.f32 %v2512_v5, %v3367_v48  ;;  %v2540_v11 = vsel %vm759_vm15, 1.0, %v2835_v57  ;;  %v2568_v25 = vsel %vm951_vm1, 1.0, %v2835_v57  ;;  %vm1143_vm5 = vcmp.eq.f32.partialorder %v3129_v46, %v3354_v47 }
 0x13b   : > { %v1095_v20 = vadd.f32 %v1067_v44, %v903_v6  ;;  %2219 = vmatpush.msra.mxu0 %v1286_v23  ;;  %v866_v22 = vmul.f32 %v2540_v11, %v3369_v8  ;;  %v1058_v63 = vmul.f32 %v2568_v25, %v3382_v39  ;;  %v2596_v15 = vsel %vm1143_vm5, 1.0, %v2835_v57 }
 0x13c   : > { %vm568_vm6 = vcmp.eq.f32.partialorder %v3129_v46, %v3375_v49  ;;  %v1250_v40 = vmul.f32 %v2596_v15, %v3373_v29  ;;  %vm760_vm8 = vcmp.eq.f32.partialorder %v3129_v46, %v3388_v36  ;;  %2742 = vmatmul.msk.f32.gmra.mxu2 %vm2027_vm7, %v3405_v61  ;;  %vm952_vm9 = vcmp.eq.f32.partialorder %v3129_v46, %v3398_v21 }
 0x13d   : > { %v1287_v38 = vadd.f32 %v1259_v16, %v1095_v20  ;;  %v2513_v35 = vsel %vm568_vm6, 1.0, %v2835_v57  ;;  %v894_v9 = vadd.f32 %v866_v22, %v674_v2  ;;  %v2541_v6 = vsel %vm760_vm8, 1.0, %v2835_v57  ;;  %2729 = vmatmul.msk.f32.gmra.mxu3 %vm2027_vm7, %v3264_v33  ;;  %2734 = vmatmul.msk.f32.gmra.mxu0 %vm2027_vm7, %v3264_v33 }
 0x13e   : > { %v675_v3 = vmul.f32 %v2513_v35, %v3377_v51  ;;  %v867_v44 = vmul.f32 %v2541_v6, %v3393_v0  ;;  %v2569_v16 = vsel %vm952_vm9, 1.0, %v2835_v57  ;;  %vm1144_vm10 = vcmp.eq.f32.partialorder %v3129_v46, %v3418_v34 }
 0x13f   : > { %2248 = vmatpush.msrb.mxu1 %v1287_v38  ;;  %vm569_vm11 = vcmp.eq.f32.partialorder %v3129_v46, %v3425_v41  ;;  %v1086_v5 = vadd.f32 %v1058_v63, %v894_v9  ;;  %v1059_v23 = vmul.f32 %v2569_v16, %v3410_v1  ;;  %v2597_v2 = vsel %vm1144_vm10, 1.0, %v2835_v57 }
 0x140   : > { %v2514_v20 = vsel %vm569_vm11, 1.0, %v2835_v57  ;;  %v895_v11 = vadd.f32 %v867_v44, %v675_v3  ;;  %v1251_v25 = vmul.f32 %v2597_v2, %v3420_v60  ;;  %vm761_vm12 = vcmp.eq.f32.partialorder %v3129_v46, %v3441_v17 }
 0x141   : > { %v676_v22 = vmul.f32 %v2514_v20, %v3437_v45  ;;  %v1278_v15 = vadd.f32 %v1250_v40, %v1086_v5  ;;  %v2542_v63 = vsel %vm761_vm12, 1.0, %v2835_v57  ;;  %vm953_vm13 = vcmp.eq.f32.partialorder %v3129_v46, %v3446_v56 }
 0x142   : > { %vm1145_vm14 = vcmp.eq.f32.partialorder %v3129_v46, %v3460_v28  ;;  %v1087_v38 = vadd.f32 %v1059_v23, %v895_v11  ;;  %v868_v35 = vmul.f32 %v2542_v63, %v3443_v13  ;;  %v2570_v9 = vsel %vm953_vm13, 1.0, %v2835_v57 }
 0x143   : > { %v2598_v3 = vsel %vm1145_vm14, 1.0, %v2835_v57  ;;  %2191 = vmatpush.msra.mxu3 %v1278_v15  ;;  %v1060_v6 = vmul.f32 %v2570_v9, %v3458_v32  ;;  %vm560_vm15 = vcmp.eq.f32.partialorder %v3125_v31, %v3328_v37  ;;  %vm752_vm1 = vcmp.eq.f32.partialorder %v3125_v31, %v3330_v24 }
 0x144   : > { %v1252_v40 = vmul.f32 %v2598_v3, %v3465_v43  ;;  %v1279_v44 = vadd.f32 %v1251_v25, %v1087_v38  ;;  %v896_v16 = vadd.f32 %v868_v35, %v676_v22  ;;  %v2505_v5 = vsel %vm560_vm15, 1.0, %v2835_v57  ;;  %2743 = vmatmul.msk.f32.gmra.mxu2 %vm2027_vm7, %v3528_v12 }
 0x145   : > { %v2533_v23 = vsel %vm752_vm1, 1.0, %v2835_v57  ;;  %v667_v2 = vmul.f32 %v2505_v5, %v3367_v48  ;;  %vm944_vm5 = vcmp.eq.f32.partialorder %v3125_v31, %v3334_v59  ;;  %vm1136_vm6 = vcmp.eq.f32.partialorder %v3125_v31, %v3354_v47 }
 0x146   : > { %v859_v20 = vmul.f32 %v2533_v23, %v3369_v8  ;;  %2220 = vmatpush.msra.mxu0 %v1279_v44  ;;  %v1088_v37 = vadd.f32 %v1060_v6, %v896_v16  ;;  %v2561_v24 = vsel %vm944_vm5, 1.0, %v2835_v57  ;;  %v2589_v11 = vsel %vm1136_vm6, 1.0, %v2835_v57 }
 0x147   : > { %vm561_vm8 = vcmp.eq.f32.partialorder %v3125_v31, %v3375_v49  ;;  %v1051_v48 = vmul.f32 %v2561_v24, %v3382_v39  ;;  %v1243_v8 = vmul.f32 %v2589_v11, %v3373_v29  ;;  %vm753_vm9 = vcmp.eq.f32.partialorder %v3125_v31, %v3388_v36 }
 0x148   : > { %v887_v25 = vadd.f32 %v859_v20, %v667_v2  ;;  %v2506_v22 = vsel %vm561_vm8, 1.0, %v2835_v57  ;;  %v1280_v59 = vadd.f32 %v1252_v40, %v1088_v37  ;;  %vm945_vm10 = vcmp.eq.f32.partialorder %v3125_v31, %v3398_v21 }
 0x149   : > { %v668_v15 = vmul.f32 %v2506_v22, %v3377_v51  ;;  %v2534_v63 = vsel %vm753_vm9, 1.0, %v2835_v57  ;;  %v2562_v49 = vsel %vm945_vm10, 1.0, %v2835_v57  ;;  %vm1137_vm11 = vcmp.eq.f32.partialorder %v3125_v31, %v3418_v34 }
 0x14a   : > { %v1079_v47 = vadd.f32 %v1051_v48, %v887_v25  ;;  %2249 = vmatpush.msrb.mxu1 %v1280_v59  ;;  %v860_v29 = vmul.f32 %v2534_v63, %v3393_v0  ;;  %v1052_v39 = vmul.f32 %v2562_v49, %v3410_v1  ;;  %v2590_v51 = vsel %vm1137_vm11, 1.0, %v2835_v57 }
 0x14b   : > { %vm562_vm12 = vcmp.eq.f32.partialorder %v3125_v31, %v3425_v41  ;;  %v1244_v21 = vmul.f32 %v2590_v51, %v3420_v60  ;;  %vm754_vm13 = vcmp.eq.f32.partialorder %v3125_v31, %v3441_v17  ;;  %vm946_vm14 = vcmp.eq.f32.partialorder %v3125_v31, %v3446_v56 }
 0x14c   : > { %v1271_v36 = vadd.f32 %v1243_v8, %v1079_v47  ;;  %v2507_v38 = vsel %vm562_vm12, 1.0, %v2835_v57  ;;  %v888_v35 = vadd.f32 %v860_v29, %v668_v15  ;;  %v2535_v0 = vsel %vm754_vm13, 1.0, %v2835_v57  ;;  %2744 = vmatmul.msk.f32.gmra.mxu2 %vm2027_vm7, %v3264_v33 }
 0x14d   : > { %v669_v34 = vmul.f32 %v2507_v38, %v3437_v45  ;;  %v861_v1 = vmul.f32 %v2535_v0, %v3443_v13  ;;  %v2563_v60 = vsel %vm946_vm14, 1.0, %v2835_v57  ;;  %vm1138_vm15 = vcmp.eq.f32.partialorder %v3125_v31, %v3460_v28 }
 0x14e   : > { %2192 = vmatpush.msra.mxu3 %v1271_v36  ;;  %v1080_v41 = vadd.f32 %v1052_v39, %v888_v35  ;;  %v1053_v17 = vmul.f32 %v2563_v60, %v3458_v32  ;;  %v2591_v45 = vsel %vm1138_vm15, 1.0, %v2835_v57  ;;  %v1296_v6 = vperm.slane %v2921_v26, 2 }
 0x14f   : > { %2746 = vmatmul.msk.f32.vlgmr.msra.gmra.mxu3 %vm2027_vm7, %v3220_v62  ;;  %v889_v56 = vadd.f32 %v861_v1, %v669_v34  ;;  %v1245_v9 = vmul.f32 %v2591_v45, %v3465_v43  ;;  %v1478_v32 = vperm.slane %v2918_v19, 2  ;;  %v1660_v44 = vperm.slane %v2923_v27, 2 }
 0x150   : > { %v1272_v3 = vadd.f32 %v1244_v21, %v1080_v41  ;;  %v3657_v28 = vperm.slane %v1296_v6, 0  ;;  %v1401_v43 = vperm.slane %v2942_v52, 2  ;;  %v1583_v5 = vperm.slane %v2944_v53, 2 }
 0x151   : > { %v1081_v13 = vadd.f32 %v1053_v17, %v889_v56  ;;  %v3668_v16 = vperm.slane %v1478_v32, 0  ;;  %v1297_v23 = vperm.slane %v2921_v26, 4  ;;  %v3672_v2 = vperm.slane %v1660_v44, 0 }
 0x152   : > { %2221 = vmatpush.msra.mxu0 %v1272_v3  ;;  %vm1317_vm1 = vcmp.eq.f32.partialorder %v3125_v31, %v3657_v28  ;;  %v1479_v20 = vperm.slane %v2918_v19, 4  ;;  %v3675_v37 = vperm.slane %v1401_v43, 0  ;;  %v1765_v24 = vperm.slane %v2948_v55, 2 }
 0x153   : > { %v1273_v40 = vadd.f32 %v1245_v9, %v1081_v13  ;;  %2751 = vmatmul.msk.f32.vlgmr.msra.gmra.mxu0 %vm2027_vm7, %v3220_v62  ;;  %v1842_v11 = vperm.slane %v2925_v30, 2  ;;  %vm1499_vm5 = vcmp.eq.f32.partialorder %v3125_v31, %v3668_v16  ;;  %v3684_v25 = vperm.slane %v1583_v5, 0 }
 0x154   : > { %v3686_v48 = vperm.slane %v1297_v23, 0  ;;  %v1402_v8 = vperm.slane %v2942_v52, 4  ;;  %vm1681_vm6 = vcmp.eq.f32.partialorder %v3125_v31, %v3672_v2  ;;  %v3691_v22 = vperm.slane %v1479_v20, 0 }
 0x155   : > { %2250 = vmatpush.msrb.mxu1 %v1273_v40  ;;  %4470 = vst [vmem:[#allocation8_spill] sm:$0xff] %v3684_v25  ;;  %v1584_v59 = vperm.slane %v2944_v53, 4  ;;  %v1661_v15 = vperm.slane %v2923_v27, 4  ;;  %v1295_v63 = vperm.slane %v2921_v26, 0  ;;  %v1477_v49 = vperm.slane %v2918_v19, 0 }
 0x156   : > { %2756 = vmatmul.msk.f32.vlgmr.msrb.gmra.mxu1 %vm2027_vm7, %v3220_v62  ;;  %v2614_v62 = vsel %vm1317_vm1, 1.0, %v2835_v57  ;;  %v2642_v29 = vsel %vm1499_vm5, 1.0, %v2835_v57  ;;  %v3703_v39 = vperm.slane %v1765_v24, 0  ;;  %v3705_v51 = vperm.slane %v1842_v11, 0 }
 0x157   : > { %2747 = vmatmul.msk.f32.gmra.mxu3 %vm2027_vm7, %v3405_v61  ;;  %v1422_v47 = vmul.f32 %v2614_v62, %v3675_v37  ;;  %v1947_v36 = vperm.slane %v2946_v54, 2  ;;  %v1604_v21 = vmul.f32 %v2642_v29, %v3684_v25  ;;  %vm1318_vm8 = vcmp.eq.f32.partialorder %v3125_v31, %v3686_v48 }
 0x158   : > { %v3712_v38 = vperm.slane %v1402_v8, 0  ;;  %vm1500_vm9 = vcmp.eq.f32.partialorder %v3125_v31, %v3691_v22  ;;  %v3716_v35 = vperm.slane %v1584_v59, 0  ;;  %v3718_v34 = vperm.slane %v1661_v15, 0 }
 0x159   : > { %v1843_v0 = vperm.slane %v2925_v30, 4  ;;  %v3721_v1 = vperm.slane %v1295_v63, 0  ;;  %v1400_v60 = vperm.slane %v2942_v52, 0  ;;  %v3724_v41 = vperm.slane %v1477_v49, 0 }
 0x15a   : > { %v1582_v17 = vperm.slane %v2944_v53, 0  ;;  %vm1863_vm10 = vcmp.eq.f32.partialorder %v3125_v31, %v3705_v51  ;;  %v3732_v56 = vperm.slane %v1947_v36, 0  ;;  %v1766_v9 = vperm.slane %v2948_v55, 4 }
 0x15b   : > { %2752 = vmatmul.msk.f32.gmra.mxu0 %vm2027_vm7, %v3405_v61  ;;  %v1632_v3 = vadd.f32 %v1604_v21, %v1422_v47  ;;  %v2615_v6 = vsel %vm1318_vm8, 1.0, %v2835_v57  ;;  %v2643_v13 = vsel %vm1500_vm9, 1.0, %v2835_v57  ;;  %v1659_v40 = vperm.slane %v2923_v27, 0 }
 0x15c   : > { %v1423_v32 = vmul.f32 %v2615_v6, %v3712_v38  ;;  %v1605_v44 = vmul.f32 %v2643_v13, %v3716_v35  ;;  %vm1682_vm11 = vcmp.eq.f32.partialorder %v3125_v31, %v3718_v34  ;;  %v3745_v43 = vperm.slane %v1843_v0, 0 }
 0x15d   : > { %vm1316_vm12 = vcmp.eq.f32.partialorder %v3125_v31, %v3721_v1  ;;  %v3753_v5 = vperm.slane %v1400_v60, 0  ;;  %vm1498_vm13 = vcmp.eq.f32.partialorder %v3125_v31, %v3724_v41  ;;  %v3757_v23 = vperm.slane %v1582_v17, 0 }
 0x15e   : > { %2757 = vmatmul.msk.f32.gmra.mxu1 %vm2027_vm7, %v3405_v61  ;;  %v2670_v61 = vsel %vm1681_vm6, 1.0, %v2835_v57  ;;  %v3759_v20 = vperm.slane %v1766_v9, 0  ;;  %v1841_v62 = vperm.slane %v2925_v30, 0  ;;  %vm1339_vm14 = vcmp.eq.f32.partialorder %v2911_v7, %v3686_v48 }
 0x15f   : > { %2748 = vmatmul.msk.f32.gmra.mxu3 %vm2027_vm7, %v3528_v12  ;;  %v1786_v45 = vmul.f32 %v2670_v61, %v3703_v39  ;;  %vm1521_vm15 = vcmp.eq.f32.partialorder %v2911_v7, %v3691_v22  ;;  %v1948_v24 = vperm.slane %v2946_v54, 4  ;;  %v3768_v11 = vperm.slane %v1659_v40, 0 }
 0x160   : > { %v1764_v8 = vperm.slane %v2948_v55, 0  ;;  %v1633_v59 = vadd.f32 %v1605_v44, %v1423_v32  ;;  %vm1864_vm1 = vcmp.eq.f32.partialorder %v3125_v31, %v3745_v43  ;;  %v2613_v15 = vsel %vm1316_vm12, 1.0, %v2835_v57 }
 0x161   : > { %v2641_v47 = vsel %vm1498_vm13, 1.0, %v2835_v57  ;;  %v1421_v63 = vmul.f32 %v2613_v15, %v3753_v5  ;;  %v2636_v29 = vsel %vm1339_vm14, 1.0, %v2835_v57  ;;  %v2664_v36 = vsel %vm1521_vm15, 1.0, %v2835_v57 }
 0x162   : > { %v1603_v49 = vmul.f32 %v2641_v47, %v3757_v23  ;;  %v3781_v21 = vperm.slane %v1841_v62, 0  ;;  %v1946_v61 = vperm.slane %v2946_v54, 0  ;;  %v1444_v0 = vmul.f32 %v2636_v29, %v3712_v38 }
 0x163   : > { %2753 = vmatmul.msk.f32.gmra.mxu0 %vm2027_vm7, %v3528_v12  ;;  %v1626_v60 = vmul.f32 %v2664_v36, %v3716_v35  ;;  %v3787_v9 = vperm.slane %v1948_v24, 0  ;;  %vm1680_vm5 = vcmp.eq.f32.partialorder %v3125_v31, %v3768_v11  ;;  %v3791_v6 = vperm.slane %v1764_v8, 0 }
 0x164   : > { %v2698_v13 = vsel %vm1863_vm10, 1.0, %v2835_v57  ;;  %vm1703_vm6 = vcmp.eq.f32.partialorder %v2911_v7, %v3718_v34  ;;  %v1814_v40 = vadd.f32 %v1786_v45, %v1632_v3  ;;  %v2699_v44 = vsel %vm1864_vm1, 1.0, %v2835_v57 }
 0x165   : > { %v1631_v62 = vadd.f32 %v1603_v49, %v1421_v63  ;;  %vm1862_vm8 = vcmp.eq.f32.partialorder %v3125_v31, %v3781_v21  ;;  %v3808_v24 = vperm.slane %v1946_v61, 0  ;;  %v1654_v8 = vadd.f32 %v1626_v60, %v1444_v0 }
 0x166   : > { %2758 = vmatmul.msk.f32.gmra.mxu1 %vm2027_vm7, %v3528_v12  ;;  %v2671_v12 = vsel %vm1682_vm11, 1.0, %v2835_v57  ;;  %v1968_v15 = vmul.f32 %v2698_v13, %v3732_v56  ;;  %v2692_v3 = vsel %vm1703_vm6, 1.0, %v2835_v57  ;;  %vm1324_vm9 = vcmp.eq.f32.partialorder %v3129_v46, %v3657_v28 }
 0x167   : > { %2749 = vmatmul.msk.f32.gmra.mxu3 %vm2027_vm7, %v3264_v33  ;;  %v1787_v17 = vmul.f32 %v2671_v12, %v3759_v20  ;;  %v2669_v12 = vsel %vm1680_vm5, 1.0, %v2835_v57  ;;  %vm1506_vm10 = vcmp.eq.f32.partialorder %v3129_v46, %v3668_v16  ;;  %v2697_v49 = vsel %vm1862_vm8, 1.0, %v2835_v57 }
 0x168   : > { %v1785_v45 = vmul.f32 %v2669_v12, %v3791_v6  ;;  %v3821_v47 = vadd.f32 %v1968_v15, %v1814_v40  ;;  %v1967_v36 = vmul.f32 %v2697_v49, %v3808_v24  ;;  %vm1688_vm11 = vcmp.eq.f32.partialorder %v3129_v46, %v3672_v2 }
 0x169   : > { %v1815_v32 = vadd.f32 %v1787_v17, %v1633_v59  ;;  %v1808_v59 = vmul.f32 %v2692_v3, %v3759_v20  ;;  %v2621_v60 = vsel %vm1324_vm9, 1.0, %v2835_v57  ;;  %v2649_v17 = vsel %vm1506_vm10, 1.0, %v2835_v57 }
 0x16a   : > { %v1813_v63 = vadd.f32 %v1785_v45, %v1631_v62  ;;  %v1298_v13 = vperm.slane %v2921_v26, 6  ;;  %vm1325_vm12 = vcmp.eq.f32.partialorder %v3129_v46, %v3686_v48  ;;  %v2677_v12 = vsel %vm1688_vm11, 1.0, %v2835_v57 }
 0x16b   : > { %2754 = vmatmul.msk.f32.gmra.mxu0 %vm2027_vm7, %v3264_v33  ;;  %v1836_v61 = vadd.f32 %v1808_v59, %v1654_v8  ;;  %vm1870_vm13 = vcmp.eq.f32.partialorder %v3129_v46, %v3705_v51  ;;  %v1480_v8 = vperm.slane %v2918_v19, 6  ;;  %vm1507_vm14 = vcmp.eq.f32.partialorder %v3129_v46, %v3691_v22 }
 0x16c   : > { %v3838_v62 = vadd.f32 %v1967_v36, %v1813_v63  ;;  %vm1323_vm15 = vcmp.eq.f32.partialorder %v3129_v46, %v3721_v1  ;;  %vm1505_vm1 = vcmp.eq.f32.partialorder %v3129_v46, %v3724_v41  ;;  %v1793_v26 = vmul.f32 %v2677_v12, %v3703_v39 }
 0x16d   : > { %v3854_v45 = vperm.slane %v1298_v13, 0  ;;  %v1403_v3 = vperm.slane %v2942_v52, 6  ;;  %v3857_v59 = vperm.slane %v1480_v8, 0  ;;  %v1585_v63 = vperm.slane %v2944_v53, 6 }
 0x16e   : > { %2759 = vmatmul.msk.f32.gmra.mxu1 %vm2027_vm7, %v3264_v33  ;;  %v1969_v33 = vmul.f32 %v2699_v44, %v3787_v9  ;;  %vm1885_vm7 = vcmp.eq.f32.partialorder %v2911_v7, %v3745_v43  ;;  %v1429_v44 = vmul.f32 %v2621_v60, %v3675_v37  ;;  %v1662_v49 = vperm.slane %v2923_v27, 6 }
 0x16f   : > { %v2720_v0 = vsel %vm1885_vm7, 1.0, %v2835_v57  ;;  %v2648_v60 = vsel %vm1505_vm1, 1.0, %v2835_v57  ;;  %vm1689_vm5 = vcmp.eq.f32.partialorder %v3129_v46, %v3718_v34  ;;  %vm1687_vm6 = vcmp.eq.f32.partialorder %v3129_v46, %v3768_v11 }
 0x170   : > { %v3824_v29 = vadd.f32 %v1969_v33, %v1815_v32  ;;  %v1990_v40 = vmul.f32 %v2720_v0, %v3787_v9  ;;  %v1611_v32 = vmul.f32 %v2649_v17, %v3684_v25  ;;  %v2622_v33 = vsel %vm1325_vm12, 1.0, %v2835_v57 }
 0x171   : > { %v1430_v36 = vmul.f32 %v2622_v33, %v3712_v38  ;;  %v2620_v0 = vsel %vm1323_vm15, 1.0, %v2835_v57  ;;  %v1610_v13 = vmul.f32 %v2648_v60, %v3757_v23  ;;  %vm1319_vm8 = vcmp.eq.f32.partialorder %v3125_v31, %v3854_v45 }
 0x172   : > { %v3844_v15 = vadd.f32 %v1990_v40, %v1836_v61  ;;  %v1639_v19 = vadd.f32 %v1611_v32, %v1429_v44  ;;  %v2650_v61 = vsel %vm1507_vm14, 1.0, %v2835_v57  ;;  %v1428_v52 = vmul.f32 %v2620_v0, %v3753_v5 }
 0x173   : > { %v1612_v17 = vmul.f32 %v2650_v61, %v3716_v35  ;;  %v3874_v27 = vperm.slane %v1403_v3, 0  ;;  %v1844_v53 = vperm.slane %v2925_v30, 6  ;;  %v2705_v40 = vsel %vm1870_vm13, 1.0, %v2835_v57 }
 0x174   : > { %vm1501_vm7 = vcmp.eq.f32.partialorder %v3125_v31, %v3857_v59  ;;  %v3883_v44 = vperm.slane %v1585_v63, 0  ;;  %v3885_v32 = vperm.slane %v1662_v49, 0  ;;  %v1821_v12 = vadd.f32 %v1793_v26, %v1639_v19 }
 0x175   : > { %v1975_v8 = vmul.f32 %v2705_v40, %v3732_v56  ;;  %v2678_v33 = vsel %vm1689_vm5, 1.0, %v2835_v57  ;;  %vm1871_vm9 = vcmp.eq.f32.partialorder %v3129_v46, %v3745_v43  ;;  %v1640_v30 = vadd.f32 %v1612_v17, %v1430_v36 }
 0x176   : > { %v2676_v3 = vsel %vm1687_vm6, 1.0, %v2835_v57  ;;  %v2616_v61 = vsel %vm1319_vm8, 1.0, %v2835_v57  ;;  %v1767_v0 = vperm.slane %v2948_v55, 6  ;;  %v1638_v60 = vadd.f32 %v1610_v13, %v1428_v52 }
 0x177   : > { %v1424_v63 = vmul.f32 %v2616_v61, %v3874_v27  ;;  %v2644_v49 = vsel %vm1501_vm7, 1.0, %v2835_v57  ;;  %v3896_v26 = vperm.slane %v1844_v53, 0  ;;  %vm1683_vm10 = vcmp.eq.f32.partialorder %v3125_v31, %v3885_v32 }
 0x178   : > { %v1606_v19 = vmul.f32 %v2644_v49, %v3883_v44  ;;  %v1949_v36 = vperm.slane %v2946_v54, 6  ;;  %vm1331_vm11 = vcmp.eq.f32.partialorder %v2940_v50, %v3657_v28  ;;  %v1794_v17 = vmul.f32 %v2678_v33, %v3759_v20 }
 0x179   : > { %v2706_v55 = vsel %vm1871_vm9, 1.0, %v2835_v57  ;;  %v1792_v52 = vmul.f32 %v2676_v3, %v3791_v6  ;;  %vm1513_vm12 = vcmp.eq.f32.partialorder %v2940_v50, %v3668_v16  ;;  %vm1869_vm13 = vcmp.eq.f32.partialorder %v3129_v46, %v3781_v21 }
 0x17a   : > { %v3911_v13 = vperm.slane %v1767_v0, 0  ;;  %vm1332_vm14 = vcmp.eq.f32.partialorder %v2940_v50, %v3686_v48  ;;  %vm1514_vm15 = vcmp.eq.f32.partialorder %v2940_v50, %v3691_v22  ;;  %v1822_v54 = vadd.f32 %v1794_v17, %v1640_v30 }
 0x17b   : > { %v1820_v53 = vadd.f32 %v1792_v52, %v1638_v60  ;;  %v2672_v40 = vsel %vm1683_vm10, 1.0, %v2835_v57  ;;  %v2628_v33 = vsel %vm1331_vm11, 1.0, %v2835_v57  ;;  %v1634_v3 = vadd.f32 %v1606_v19, %v1424_v63 }
 0x17c   : > { %vm1865_vm1 = vcmp.eq.f32.partialorder %v3125_v31, %v3896_v26  ;;  %v3921_v61 = vperm.slane %v1949_v36, 0  ;;  %v2656_v0 = vsel %vm1513_vm12, 1.0, %v2835_v57  ;;  %v1436_v49 = vmul.f32 %v2628_v33, %v3675_v37 }
 0x17d   : > { %v1618_v48 = vmul.f32 %v2656_v0, %v3684_v25  ;;  %v2629_v22 = vsel %vm1332_vm14, 1.0, %v2835_v57  ;;  %v2657_v30 = vsel %vm1514_vm15, 1.0, %v2835_v57  ;;  %v2704_v60 = vsel %vm1869_vm13, 1.0, %v2835_v57 }
 0x17e   : > { %v1788_v63 = vmul.f32 %v2672_v40, %v3911_v13  ;;  %v1437_v19 = vmul.f32 %v2629_v22, %v3712_v38  ;;  %v1619_v36 = vmul.f32 %v2657_v30, %v3716_v35  ;;  %v3935_v52 = vadd.f32 %v1975_v8, %v1821_v12 }
 0x17f   : > { %v2107_v17 = vpop.f32.mrf.mxu0  ;;  %v1976_v33 = vmul.f32 %v2706_v55, %v3787_v9  ;;  %v1974_v0 = vmul.f32 %v2704_v60, %v3808_v24  ;;  %vm1695_vm5 = vcmp.eq.f32.partialorder %v2940_v50, %v3672_v2  ;;  %v2700_v40 = vsel %vm1865_vm1, 1.0, %v2835_v57 }
 0x180   : > { %v2078_v4 = vpop.f32.mrf.mxu3  ;;  %v1816_v25 = vadd.f32 %v1788_v63, %v1634_v3  ;;  %vm1877_vm6 = vcmp.eq.f32.partialorder %v2940_v50, %v3705_v51  ;;  %vm1696_vm8 = vcmp.eq.f32.partialorder %v2940_v50, %v3718_v34  ;;  %v1970_v12 = vmul.f32 %v2700_v40, %v3921_v61 }
 0x181   : > { %v3949_v38 = vadd.f32 %v1976_v33, %v1822_v54  ;;  %v3951_v35 = vadd.f32 %v1974_v0, %v1820_v53  ;;  %v1646_v8 = vadd.f32 %v1618_v48, %v1436_v49  ;;  %v3955_v55 = vmul.f32 %v2107_v17, %v3821_v47 }
 0x182   : > { %v2684_v3 = vsel %vm1695_vm5, 1.0, %v2835_v57  ;;  %v1647_v22 = vadd.f32 %v1619_v36, %v1437_v19  ;;  %vm1878_vm7 = vcmp.eq.f32.partialorder %v2940_v50, %v3745_v43  ;;  %v3961_v60 = vmul.f32 %v2078_v4, %v3838_v62 }
 0x183   : > { %v1800_v34 = vmul.f32 %v2684_v3, %v3703_v39  ;;  %v2712_v54 = vsel %vm1877_vm6, 1.0, %v2835_v57  ;;  %v2685_v53 = vsel %vm1696_vm8, 1.0, %v2835_v57  ;;  %v3966_v49 = vadd.f32 %v1970_v12, %v1816_v25 }
 0x184   : > { %v2136_v30 = vpop.f32.mrf.mxu1  ;;  %v1801_v47 = vmul.f32 %v2685_v53, %v3759_v20  ;;  %vm1330_vm9 = vcmp.eq.f32.partialorder %v2940_v50, %v3721_v1  ;;  %vm1512_vm10 = vcmp.eq.f32.partialorder %v2940_v50, %v3724_v41  ;;  %v1982_v4 = vmul.f32 %v2712_v54, %v3732_v56 }
 0x185   : > { %4471 = vst [vmem:[#allocation9_spill] sm:$0xff] %v3966_v49  ;;  %v1828_v43 = vadd.f32 %v1800_v34, %v1646_v8  ;;  %v2713_v62 = vsel %vm1878_vm7, 1.0, %v2835_v57  ;;  %vm1694_vm11 = vcmp.eq.f32.partialorder %v2940_v50, %v3768_v11  ;;  %v3978_v48 = vmul.f32 %v2136_v30, %v3824_v29 }
 0x186   : > { %v1829_v25 = vadd.f32 %v1801_v47, %v1647_v22  ;;  %v1983_v20 = vmul.f32 %v2713_v62, %v3787_v9  ;;  %vm1876_vm12 = vcmp.eq.f32.partialorder %v2940_v50, %v3781_v21  ;;  %v2627_v63 = vsel %vm1330_vm9, 1.0, %v2835_v57 }
 0x187   : > { %v2655_v19 = vsel %vm1512_vm10, 1.0, %v2835_v57  ;;  %vm1326_vm13 = vcmp.eq.f32.partialorder %v3129_v46, %v3854_v45  ;;  %v1301_v36 = vperm.slane %v2971_v14, 4  ;;  %v1435_v17 = vmul.f32 %v2627_v63, %v3753_v5 }
 0x188   : > { %v1617_v29 = vmul.f32 %v2655_v19, %v3757_v23  ;;  %v2683_v33 = vsel %vm1694_vm11, 1.0, %v2835_v57  ;;  %v1483_v9 = vperm.slane %v2963_v10, 4  ;;  %v3992_v40 = vadd.f32 %v1982_v4, %v1828_v43 }
 0x189   : > { %v1799_v12 = vmul.f32 %v2683_v33, %v3791_v6  ;;  %v2711_v8 = vsel %vm1876_vm12, 1.0, %v2835_v57  ;;  %vm1508_vm14 = vcmp.eq.f32.partialorder %v3129_v46, %v3857_v59  ;;  %v3998_v3 = vadd.f32 %v1983_v20, %v1829_v25  ;;  %v4474_v20 = vld [vmem:[#allocation5_spill] sm:$0xff] }
 0x18a   : > { %v2145_v0 = vpop.f32.mrf.mxu2  ;;  %4472 = vst [vmem:[#allocation10_spill] sm:$0xff] %v3992_v40  ;;  %v4001_v22 = vmul.f32 %v2711_v8, %v3808_v24  ;;  %v2623_v30 = vsel %vm1326_vm13, 1.0, %v2835_v57  ;;  %v1665_v34 = vperm.slane %v2977_v18, 4  ;;  %vm1338_vm15 = vcmp.eq.f32.partialorder %v2911_v7, %v3657_v28 }
 0x18b   : > { %4473 = vst [vmem:[#allocation11_spill] sm:$0xff] %v3998_v3  ;;  %vm1520_vm1 = vcmp.eq.f32.partialorder %v2911_v7, %v3668_v16  ;;  %v4009_v54 = vperm.slane %v1301_v36, 0  ;;  %v4011_v53 = vperm.slane %v1483_v9, 0  ;;  %v2287_v47 = vmul.f32 %v2145_v0, %v3844_v15  ;;  %v4476_v0 = vld [vmem:[#allocation7_spill] sm:$0xff] }
 0x18c   : > { %v1645_v43 = vadd.f32 %v1617_v29, %v1435_v17  ;;  %v2651_v4 = vsel %vm1508_vm14, 1.0, %v2835_v57  ;;  %vm1690_vm5 = vcmp.eq.f32.partialorder %v3129_v46, %v3885_v32  ;;  %v1431_v62 = vmul.f32 %v2623_v30, %v3874_v27  ;;  %v4475_v29 = vld [vmem:[#allocation8_spill] sm:$0xff] }
 0x18d   : > { %v1613_v25 = vmul.f32 %v2651_v4, %v3883_v44  ;;  %v1406_v28 = vperm.slane %v3343_v42, 4  ;;  %v1588_v16 = vperm.slane %v4474_v20, 4  ;;  %v2635_v63 = vsel %vm1338_vm15, 1.0, %v2835_v57 }
 0x18e   : > { %v2663_v19 = vsel %vm1520_vm1, 1.0, %v2835_v57  ;;  %v4023_v36 = vperm.slane %v1665_v34, 0  ;;  %v1847_v15 = vperm.slane %v3103_v58, 4  ;;  %v1443_v17 = vmul.f32 %v2635_v63, %v3675_v37 }
 0x18f   : > { %v1625_v33 = vmul.f32 %v2663_v19, %v4475_v29  ;;  %vm1322_vm6 = vcmp.eq.f32.partialorder %v3125_v31, %v4009_v54  ;;  %vm1504_vm8 = vcmp.eq.f32.partialorder %v3125_v31, %v4011_v53  ;;  %v2679_v9 = vsel %vm1690_vm5, 1.0, %v2835_v57 }
 0x190   : > { %vm1872_vm7 = vcmp.eq.f32.partialorder %v3129_v46, %v3896_v26  ;;  %vm1702_vm9 = vcmp.eq.f32.partialorder %v2911_v7, %v3672_v2  ;;  %v1770_v8 = vperm.slane %v4476_v0, 4  ;;  %v4039_v37 = vsel %vm464_vm4, %v2287_v47, 0.0 }
 0x191   : > { %4477 = vst [vmem:[#allocation5_spill] sm:$0xff] %v4039_v37  ;;  %v1827_v30 = vadd.f32 %v1799_v12, %v1645_v43  ;;  %v4041_v34 = vperm.slane %v1406_v28, 0  ;;  %v4043_v4 = vperm.slane %v1588_v16, 0  ;;  %v2619_v63 = vsel %vm1322_vm6, 1.0, %v2835_v57  ;;  %v4480_v28 = vld [vmem:[#allocation6_spill] sm:$0xff] }
 0x192   : > { %v2647_v19 = vsel %vm1504_vm8, 1.0, %v2835_v57  ;;  %vm1686_vm10 = vcmp.eq.f32.partialorder %v3125_v31, %v4023_v36  ;;  %v4049_v29 = vperm.slane %v1847_v15, 0  ;;  %v1641_v2 = vadd.f32 %v1613_v25, %v1431_v62 }
 0x193   : > { %4478 = vst [vmem:[#allocation8_spill] sm:$0xff] %v4043_v4  ;;  %v1653_v49 = vadd.f32 %v1625_v33, %v1443_v17  ;;  %v2691_v40 = vsel %vm1702_vm9, 1.0, %v2835_v57  ;;  %vm1884_vm11 = vcmp.eq.f32.partialorder %v2911_v7, %v3705_v51  ;;  %v1795_v12 = vmul.f32 %v2679_v9, %v3911_v13 }
 0x194   : > { %v1807_v47 = vmul.f32 %v2691_v40, %v3703_v39  ;;  %v4056_v43 = vperm.slane %v1770_v8, 0  ;;  %v1952_v16 = vperm.slane %v4480_v28, 4  ;;  %v1427_v37 = vmul.f32 %v2619_v63, %v4041_v34 }
 0x195   : > { %v1609_v15 = vmul.f32 %v2647_v19, %v4043_v4  ;;  %v2675_v62 = vsel %vm1686_vm10, 1.0, %v2835_v57  ;;  %vm1337_vm12 = vcmp.eq.f32.partialorder %v2911_v7, %v3721_v1  ;;  %v2707_v51 = vsel %vm1872_vm7, 1.0, %v2835_v57 }
 0x196   : > { %4479 = vst [vmem:[#allocation7_spill] sm:$0xff] %v4056_v43  ;;  %v2719_v39 = vsel %vm1884_vm11, 1.0, %v2835_v57  ;;  %vm1868_vm13 = vcmp.eq.f32.partialorder %v3125_v31, %v4049_v29  ;;  %vm1519_vm14 = vcmp.eq.f32.partialorder %v2911_v7, %v3724_v41  ;;  %v1823_v40 = vadd.f32 %v1795_v12, %v1641_v2 }
 0x197   : > { %v1977_v25 = vmul.f32 %v2707_v51, %v3921_v61  ;;  %v1835_v17 = vadd.f32 %v1807_v47, %v1653_v49  ;;  %v1989_v33 = vmul.f32 %v2719_v39, %v3732_v56  ;;  %v1791_v1 = vmul.f32 %v2675_v62, %v4056_v43 }
 0x198   : > { %v4076_v9 = vperm.slane %v1952_v16, 0  ;;  %v2634_v8 = vsel %vm1337_vm12, 1.0, %v2835_v57  ;;  %v1300_v63 = vperm.slane %v2971_v14, 2  ;;  %v1637_v19 = vadd.f32 %v1609_v15, %v1427_v37  ;;  %v2139_v39 = vpop.f32.mrf.mxu1 }
 0x199   : > { %v2703_v3 = vsel %vm1868_vm13, 1.0, %v2835_v57  ;;  %v2662_v4 = vsel %vm1519_vm14, 1.0, %v2835_v57  ;;  %v1482_v41 = vperm.slane %v2963_v10, 2  ;;  %v1442_v2 = vmul.f32 %v2634_v8, %v3753_v5 }
 0x19a   : > { %4481 = vst [vmem:[#allocation6_spill] sm:$0xff] %v4076_v9  ;;  %v1624_v49 = vmul.f32 %v2662_v4, %v3757_v23  ;;  %vm1701_vm15 = vcmp.eq.f32.partialorder %v2911_v7, %v3768_v11  ;;  %vm1883_vm1 = vcmp.eq.f32.partialorder %v2911_v7, %v3781_v21  ;;  %v4090_v56 = vadd.f32 %v4001_v22, %v1827_v30  ;;  %v2110_v4 = vpop.f32.mrf.mxu0 }
 0x19b   : > { %v4092_v37 = vadd.f32 %v1977_v25, %v1823_v40  ;;  %vm1333_vm5 = vcmp.eq.f32.partialorder %v2940_v50, %v3854_v45  ;;  %v1664_v12 = vperm.slane %v2977_v18, 2  ;;  %v4097_v47 = vadd.f32 %v1989_v33, %v1835_v17 }
 0x19c   : > { %vm1515_vm6 = vcmp.eq.f32.partialorder %v2940_v50, %v3857_v59  ;;  %v4101_v5 = vperm.slane %v1300_v63, 0  ;;  %v4103_v23 = vperm.slane %v1482_v41, 0  ;;  %v1819_v11 = vadd.f32 %v1791_v1, %v1637_v19 }
 0x19d   : > { %v1973_v21 = vmul.f32 %v2703_v3, %v4076_v9  ;;  %v2690_v22 = vsel %vm1701_vm15, 1.0, %v2835_v57  ;;  %v2718_v30 = vsel %vm1883_vm1, 1.0, %v2835_v57  ;;  %v1652_v16 = vadd.f32 %v1624_v49, %v1442_v2 }
 0x19e   : > { %v2630_v15 = vsel %vm1333_vm5, 1.0, %v2835_v57  ;;  %v1405_v62 = vperm.slane %v3343_v42, 2  ;;  %v1587_v51 = vperm.slane %v4474_v20, 2  ;;  %v1806_v40 = vmul.f32 %v2690_v22, %v3791_v6 }
 0x19f   : > { %v1438_v25 = vmul.f32 %v2630_v15, %v3874_v27  ;;  %v2658_v17 = vsel %vm1515_vm6, 1.0, %v2835_v57  ;;  %v4114_v3 = vperm.slane %v1664_v12, 0  ;;  %vm1321_vm8 = vcmp.eq.f32.partialorder %v3125_v31, %v4101_v5 }
 0x1a0   : > { %v1620_v33 = vmul.f32 %v2658_v17, %v3883_v44  ;;  %vm1503_vm7 = vcmp.eq.f32.partialorder %v3125_v31, %v4103_v23  ;;  %v1846_v1 = vperm.slane %v3103_v58, 2  ;;  %v2272_v8 = vmul.f32 %v2110_v4, %v3935_v52 }
 0x1a1   : > { %v1988_v6 = vmul.f32 %v2718_v30, %v3808_v24  ;;  %vm1697_vm9 = vcmp.eq.f32.partialorder %v2940_v50, %v3885_v32  ;;  %v1769_v63 = vperm.slane %v4476_v0, 2  ;;  %v2273_v19 = vmul.f32 %v2139_v39, %v3949_v38  ;;  %v2081_v24 = vpop.f32.mrf.mxu3 }
 0x1a2   : > { %v4128_v41 = vadd.f32 %v1973_v21, %v1819_v11  ;;  %v4130_v2 = vperm.slane %v1405_v62, 0  ;;  %v4132_v49 = vperm.slane %v1587_v51, 0  ;;  %v1834_v12 = vadd.f32 %v1806_v40, %v1652_v16 }
 0x1a3   : > { %v2618_v22 = vsel %vm1321_vm8, 1.0, %v2835_v57  ;;  %v2646_v52 = vsel %vm1503_vm7, 1.0, %v2835_v57  ;;  %vm1685_vm10 = vcmp.eq.f32.partialorder %v3125_v31, %v4114_v3  ;;  %v1648_v30 = vadd.f32 %v1620_v33, %v1438_v25 }
 0x1a4   : > { %4482 = vst [vmem:[#allocation12_spill] sm:$0xff] %v4128_v41  ;;  %v2686_v4 = vsel %vm1697_vm9, 1.0, %v2835_v57  ;;  %vm1879_vm11 = vcmp.eq.f32.partialorder %v2940_v50, %v3896_v26  ;;  %v4141_v38 = vperm.slane %v1846_v1, 0  ;;  %v4144_v11 = vadd.f32 %v2272_v8, %v3955_v55 }
 0x1a5   : > { %v1802_v21 = vmul.f32 %v2686_v4, %v3911_v13  ;;  %v4147_v16 = vperm.slane %v1769_v63, 0  ;;  %v1951_v15 = vperm.slane %v4480_v28, 2  ;;  %v1426_v62 = vmul.f32 %v2618_v22, %v4130_v2 }
 0x1a6   : > { %v1608_v51 = vmul.f32 %v2646_v52, %v4132_v49  ;;  %v2674_v39 = vsel %vm1685_vm10, 1.0, %v2835_v57  ;;  %vm1329_vm12 = vcmp.eq.f32.partialorder %v3129_v46, %v4009_v54  ;;  %v2312_v40 = vadd.f32 %v2273_v19, %v3978_v48 }
 0x1a7   : > { %v2271_v55 = vmul.f32 %v2081_v24, %v3951_v35  ;;  %v2714_v25 = vsel %vm1879_vm11, 1.0, %v2835_v57  ;;  %v1299_v17 = vperm.slane %v2971_v14, 0  ;;  %v1830_v33 = vadd.f32 %v1802_v21, %v1648_v30 }
 0x1a8   : > { %vm1867_vm13 = vcmp.eq.f32.partialorder %v3125_v31, %v4141_v38  ;;  %vm1511_vm14 = vcmp.eq.f32.partialorder %v3129_v46, %v4011_v53  ;;  %v1481_v1 = vperm.slane %v2963_v10, 0  ;;  %v4164_v8 = vadd.f32 %v1988_v6, %v1834_v12 }
 0x1a9   : > { %v1984_v63 = vmul.f32 %v2714_v25, %v3921_v61  ;;  %v1790_v48 = vmul.f32 %v2674_v39, %v4147_v16  ;;  %v2626_v35 = vsel %vm1329_vm12, 1.0, %v2835_v57  ;;  %v1636_v19 = vadd.f32 %v1608_v51, %v1426_v62  ;;  %v4483_v25 = vld [vmem:[#allocation8_spill] sm:$0xff] }
 0x1aa   : > { %v4169_v22 = vperm.slane %v1951_v15, 0  ;;  %vm1693_vm15 = vcmp.eq.f32.partialorder %v3129_v46, %v4023_v36  ;;  %v4173_v14 = vperm.slane %v1299_v17, 0  ;;  %v2702_v24 = vsel %vm1867_vm13, 1.0, %v2835_v57 }
 0x1ab   : > { %v2654_v10 = vsel %vm1511_vm14, 1.0, %v2835_v57  ;;  %v4177_v6 = vperm.slane %v1481_v1, 0  ;;  %v1663_v12 = vperm.slane %v2977_v18, 0  ;;  %v4181_v30 = vadd.f32 %v2271_v55, %v3961_v60 }
 0x1ac   : > { %v4183_v4 = vadd.f32 %v1984_v63, %v1830_v33  ;;  %v1434_v21 = vmul.f32 %v2626_v35, %v4041_v34  ;;  %v1404_v15 = vperm.slane %v3343_v42, 0  ;;  %v2682_v62 = vsel %vm1693_vm15, 1.0, %v2835_v57 }
 0x1ad   : > { %vm1875_vm1 = vcmp.eq.f32.partialorder %v3129_v46, %v4049_v29  ;;  %vm1340_vm5 = vcmp.eq.f32.partialorder %v2911_v7, %v3854_v45  ;;  %v1586_v51 = vperm.slane %v4474_v20, 0  ;;  %v1818_v39 = vadd.f32 %v1790_v48, %v1636_v19  ;;  %v4484_v48 = vld [vmem:[#allocation11_spill] sm:$0xff] }
 0x1ae   : > { %v1972_v55 = vmul.f32 %v2702_v24, %v4169_v22  ;;  %v1616_v17 = vmul.f32 %v2654_v10, %v4483_v25  ;;  %vm1320_vm6 = vcmp.eq.f32.partialorder %v3125_v31, %v4173_v14  ;;  %vm1522_vm8 = vcmp.eq.f32.partialorder %v2911_v7, %v3857_v59 }
 0x1af   : > { %vm1502_vm7 = vcmp.eq.f32.partialorder %v3125_v31, %v4177_v6  ;;  %v4203_v42 = vperm.slane %v1663_v12, 0  ;;  %v1845_v45 = vperm.slane %v3103_v58, 0  ;;  %v1798_v20 = vmul.f32 %v2682_v62, %v4056_v43 }
 0x1b0   : > { %v2710_v33 = vsel %vm1875_vm1, 1.0, %v2835_v57  ;;  %v2637_v1 = vsel %vm1340_vm5, 1.0, %v2835_v57  ;;  %v4209_v63 = vperm.slane %v1404_v15, 0  ;;  %v2617_v19 = vsel %vm1320_vm6, 1.0, %v2835_v57 }
 0x1b1   : > { %v4213_v59 = vperm.slane %v1586_v51, 0  ;;  %v1768_v24 = vperm.slane %v4476_v0, 0  ;;  %v1644_v10 = vadd.f32 %v1616_v17, %v1434_v21  ;;  %v1445_v12 = vmul.f32 %v2637_v1, %v3874_v27 }
 0x1b2   : > { %v2113_v52 = vpop.f32.mrf.mxu0  ;;  %v2142_v60 = vpop.f32.mrf.mxu1  ;;  %v2665_v58 = vsel %vm1522_vm8, 1.0, %v2835_v57  ;;  %v2645_v62 = vsel %vm1502_vm7, 1.0, %v2835_v57  ;;  %vm1704_vm9 = vcmp.eq.f32.partialorder %v2911_v7, %v3885_v32  ;;  %vm1684_vm10 = vcmp.eq.f32.partialorder %v3125_v31, %v4203_v42 }
 0x1b3   : > { %v2280_v35 = vmul.f32 %v2142_v60, %v4484_v48  ;;  %v1627_v43 = vmul.f32 %v2665_v58, %v3883_v44  ;;  %v4224_v15 = vperm.slane %v1845_v45, 0  ;;  %v1980_v0 = vmul.f32 %v2710_v33, %v4076_v9 }
 0x1b4   : > { %v1425_v21 = vmul.f32 %v2617_v19, %v4209_v63  ;;  %vm1328_vm11 = vcmp.eq.f32.partialorder %v3129_v46, %v4101_v5  ;;  %vm1510_vm12 = vcmp.eq.f32.partialorder %v3129_v46, %v4103_v23  ;;  %v1607_v51 = vmul.f32 %v2645_v62, %v4213_v59  ;;  %v4485_v19 = vld [vmem:[#allocation10_spill] sm:$0xff] }
 0x1b5   : > { %v2313_v27 = vadd.f32 %v2312_v40, %v2280_v35  ;;  %v4233_v32 = vperm.slane %v1768_v24, 0  ;;  %v1950_v60 = vperm.slane %v4480_v28, 0  ;;  %v1826_v45 = vadd.f32 %v1798_v20, %v1644_v10  ;;  %v4486_v10 = vld [vmem:[#allocation5_spill] sm:$0xff] }
 0x1b6   : > { %v2693_v33 = vsel %vm1704_vm9, 1.0, %v2835_v57  ;;  %vm1886_vm13 = vcmp.eq.f32.partialorder %v2911_v7, %v3896_v26  ;;  %v2673_v1 = vsel %vm1684_vm10, 1.0, %v2835_v57  ;;  %v1655_v48 = vadd.f32 %v1627_v43, %v1445_v12 }
 0x1b7   : > { %v4193_v18 = vpop.f32.mrf.mxu2  ;;  %v2084_v41 = vpop.f32.mrf.mxu3  ;;  %vm1866_vm14 = vcmp.eq.f32.partialorder %v3125_v31, %v4224_v15  ;;  %v2625_v40 = vsel %vm1328_vm11, 1.0, %v2835_v57  ;;  %v2653_v35 = vsel %vm1510_vm12, 1.0, %v2835_v57  ;;  %v2279_v24 = vmul.f32 %v2113_v52, %v4485_v19 }
 0x1b8   : > { %v1809_v20 = vmul.f32 %v2693_v33, %v3911_v13  ;;  %vm1692_vm15 = vcmp.eq.f32.partialorder %v3129_v46, %v4114_v3  ;;  %v2315_v58 = vadd.f32 %v4486_v10, %v2313_v27  ;;  %v1635_v62 = vadd.f32 %v1607_v51, %v1425_v21 }
 0x1b9   : > { %v1789_v43 = vmul.f32 %v2673_v1, %v4233_v32  ;;  %v4251_v12 = vperm.slane %v1950_v60, 0  ;;  %v4253_v31 = vadd.f32 %v1972_v55, %v1818_v39  ;;  %v2701_v9 = vsel %vm1866_vm14, 1.0, %v2835_v57 }
 0x1ba   : > { %v2116_v44 = vpop.f32.mrf.mxu0  ;;  %v1433_v52 = vmul.f32 %v2625_v40, %v4130_v2  ;;  %v2721_v13 = vsel %vm1886_vm13, 1.0, %v2835_v57  ;;  %v2681_v21 = vsel %vm1692_vm15, 1.0, %v2835_v57  ;;  %vm1874_vm1 = vcmp.eq.f32.partialorder %v3129_v46, %v4141_v38 }
 0x1bb   : > { %v2286_v28 = vmul.f32 %v2116_v44, %v4097_v47  ;;  %v1615_v47 = vmul.f32 %v2653_v35, %v4132_v49  ;;  %v1837_v44 = vadd.f32 %v1809_v20, %v1655_v48  ;;  %v2303_v39 = vadd.f32 %v4144_v11, %v2279_v24 }
 0x1bc   : > { %v4267_v27 = vadd.f32 %v1980_v0, %v1826_v45  ;;  %v1991_v51 = vmul.f32 %v2721_v13, %v3921_v61  ;;  %v2316_v60 = vrot.slane %v2315_v58, 4  ;;  %v2278_v33 = vmul.f32 %v2084_v41, %v4090_v56  ;;  %v4487_v61 = vld [vmem:[#allocation9_spill] sm:$0xff] }
 0x1bd   : > { %v2304_v55 = vsel %vm464_vm4, %v2286_v28, 0.0  ;;  %v1817_v48 = vadd.f32 %v1789_v43, %v1635_v62  ;;  %v1971_v26 = vmul.f32 %v2701_v9, %v4251_v12  ;;  %v1643_v19 = vadd.f32 %v1615_v47, %v1433_v52 }
 0x1be   : > { %v1797_v20 = vmul.f32 %v2681_v21, %v4147_v16  ;;  %v2709_v11 = vsel %vm1874_vm1, 1.0, %v2835_v57  ;;  %v2305_v24 = vadd.f32 %v2304_v55, %v2303_v39  ;;  %v2019_v0 = vadd.f32 %v1991_v51, %v1837_v44 }
 0x1bf   : > { %v2168_v17 = vpop.f32.mrf.mxu2  ;;  %vm1336_vm5 = vcmp.eq.f32.partialorder %v2940_v50, %v4009_v54  ;;  %vm1518_vm6 = vcmp.eq.f32.partialorder %v2940_v50, %v4011_v53  ;;  %v2267_v56 = vmul.f32 %v4193_v18, %v4487_v61  ;;  %vm1327_vm8 = vcmp.eq.f32.partialorder %v3129_v46, %v4173_v14 }
 0x1c0   : > { %v2087_v1 = vpop.f32.mrf.mxu3  ;;  %v2274_v40 = vmul.f32 %v2168_v17, %v4092_v37  ;;  %vm1509_vm7 = vcmp.eq.f32.partialorder %v3129_v46, %v4177_v6  ;;  %v4286_v37 = vadd.f32 %v2316_v60, %v2315_v58  ;;  %v2293_v41 = vadd.f32 %v4181_v30, %v2278_v33 }
 0x1c1   : > { %v2285_v9 = vmul.f32 %v2087_v1, %v4164_v8  ;;  %v4289_v17 = vadd.f32 %v1971_v26, %v1817_v48  ;;  %v1979_v45 = vmul.f32 %v2709_v11, %v4169_v22  ;;  %v1825_v10 = vadd.f32 %v1797_v20, %v1643_v19 }
 0x1c2   : > { %v2322_v28 = vadd.f32 %v2274_v40, %v2267_v56  ;;  %v2633_v18 = vsel %vm1336_vm5, 1.0, %v2835_v57  ;;  %v2661_v8 = vsel %vm1518_vm6, 1.0, %v2835_v57  ;;  %v2306_v62 = vrot.slane %v2305_v24, 4  ;;  %v4488_v56 = vld [vmem:[#allocation7_spill] sm:$0xff] }
 0x1c3   : > { %vm1700_vm9 = vcmp.eq.f32.partialorder %v2940_v50, %v4023_v36  ;;  %v2624_v43 = vsel %vm1327_vm8, 1.0, %v2835_v57  ;;  %v2652_v58 = vsel %vm1509_vm7, 1.0, %v2835_v57  ;;  %v2294_v30 = vsel %vm464_vm4, %v2285_v9, 0.0 }
 0x1c4   : > { %vm1691_vm10 = vcmp.eq.f32.partialorder %v3129_v46, %v4203_v42  ;;  %vm1335_vm11 = vcmp.eq.f32.partialorder %v2940_v50, %v4101_v5  ;;  %vm1517_vm12 = vcmp.eq.f32.partialorder %v2940_v50, %v4103_v23  ;;  %v1441_v52 = vmul.f32 %v2633_v18, %v4041_v34 }
 0x1c5   : > { %v1623_v47 = vmul.f32 %v2661_v8, %v4483_v25  ;;  %v2632_v44 = vsel %vm1335_vm11, 1.0, %v2835_v57  ;;  %v2660_v13 = vsel %vm1517_vm12, 1.0, %v2835_v57  ;;  %v2689_v39 = vsel %vm1700_vm9, 1.0, %v2835_v57 }
 0x1c6   : > { %v1432_v55 = vmul.f32 %v2624_v43, %v4209_v63  ;;  %v1614_v51 = vmul.f32 %v2652_v58, %v4213_v59  ;;  %vm1699_vm13 = vcmp.eq.f32.partialorder %v2940_v50, %v4114_v3  ;;  %v4314_v60 = vadd.f32 %v2294_v30, %v2293_v41  ;;  %v4489_v30 = vld [vmem:[#allocation6_spill] sm:$0xff] }
 0x1c7   : > { %v2171_v35 = vpop.f32.mrf.mxu2  ;;  %v4316_v1 = vadd.f32 %v1979_v45, %v1825_v10  ;;  %vm1882_vm14 = vcmp.eq.f32.partialorder %v2940_v50, %v4049_v29  ;;  %v2680_v48 = vsel %vm1691_vm10, 1.0, %v2835_v57  ;;  %vm1873_vm15 = vcmp.eq.f32.partialorder %v3129_v46, %v4224_v15 }
 0x1c8   : > { %v1440_v19 = vmul.f32 %v2632_v44, %v4130_v2  ;;  %v1622_v20 = vmul.f32 %v2660_v13, %v4132_v49  ;;  %v2281_v11 = vmul.f32 %v2171_v35, %v4183_v4  ;;  %v1651_v61 = vadd.f32 %v1623_v47, %v1441_v52 }
 0x1c9   : > { %v1805_v9 = vmul.f32 %v2689_v39, %v4488_v56  ;;  %v2688_v41 = vsel %vm1699_vm13, 1.0, %v2835_v57  ;;  %v4331_v45 = vadd.f32 %v2306_v62, %v2305_v24  ;;  %v1642_v18 = vadd.f32 %v1614_v51, %v1432_v55 }
 0x1ca   : > { %vm1881_vm1 = vcmp.eq.f32.partialorder %v2940_v50, %v4141_v38  ;;  %v1796_v46 = vmul.f32 %v2680_v48, %v4233_v32  ;;  %v2708_v8 = vsel %vm1873_vm15, 1.0, %v2835_v57  ;;  %vm1343_vm5 = vcmp.eq.f32.partialorder %v2911_v7, %v4009_v54 }
 0x1cb   : > { %vm1525_vm6 = vcmp.eq.f32.partialorder %v2911_v7, %v4011_v53  ;;  %v2296_v4 = vrot.slane %v4314_v60, 4  ;;  %v1650_v24 = vadd.f32 %v1622_v20, %v1440_v19  ;;  %v1804_v62 = vmul.f32 %v2688_v41, %v4147_v16 }
 0x1cc   : > { %vm2352_vm8 = vcmask 130048   ;;  %v2323_v43 = vadd.f32 %v2322_v28, %v2281_v11  ;;  %v1833_v58 = vadd.f32 %v1805_v9, %v1651_v61  ;;  %v2716_v47 = vsel %vm1881_vm1, 1.0, %v2835_v57 }
 0x1cd   : > { %v1978_v44 = vmul.f32 %v2708_v8, %v4251_v12  ;;  %v2640_v54 = vsel %vm1343_vm5, 1.0, %v2835_v57  ;;  %v2668_v53 = vsel %vm1525_vm6, 1.0, %v2835_v57  ;;  %vm1707_vm7 = vcmp.eq.f32.partialorder %v2911_v7, %v4023_v36 }
 0x1ce   : > { %v1824_v39 = vadd.f32 %v1796_v46, %v1642_v18  ;;  %vm1334_vm9 = vcmp.eq.f32.partialorder %v2940_v50, %v4173_v14  ;;  %vm1516_vm10 = vcmp.eq.f32.partialorder %v2940_v50, %v4177_v6  ;;  %v1832_v55 = vadd.f32 %v1804_v62, %v1650_v24 }
 0x1cf   : > { %v2174_v21 = vpop.f32.mrf.mxu2  ;;  %v1986_v51 = vmul.f32 %v2716_v47, %v4169_v22  ;;  %v2631_v48 = vsel %vm1334_vm9, 1.0, %v2835_v57  ;;  %v1448_v19 = vmul.f32 %v2640_v54, %v4041_v34  ;;  %v1630_v20 = vmul.f32 %v2668_v53, %v4483_v25 }
 0x1d0   : > { %v2223_v33 = vpop.f32.mrf.mxu0  ;;  %v2288_v26 = vmul.f32 %v2174_v21, %v2019_v0  ;;  %v2717_v0 = vsel %vm1882_vm14, 1.0, %v2835_v57  ;;  %v2696_v11 = vsel %vm1707_vm7, 1.0, %v2835_v57  ;;  %vm1889_vm11 = vcmp.eq.f32.partialorder %v2911_v7, %v4049_v29 }
 0x1d1   : > { %v1987_v52 = vmul.f32 %v2717_v0, %v4489_v30  ;;  %v1439_v9 = vmul.f32 %v2631_v48, %v4209_v63  ;;  %vm1698_vm12 = vcmp.eq.f32.partialorder %v2940_v50, %v4203_v42  ;;  %v4490_v0 = vld [vmem:[#allocation12_spill] sm:$0xff]  ;;  %v2269_v46 = vmul.f32 %v2223_v33, %v4253_v31 }
 0x1d2   : > { %v2194_v40 = vpop.f32.mrf.mxu3  ;;  %v2324_v35 = vsel %vm464_vm4, %v2288_v26, 0.0  ;;  %v2659_v26 = vsel %vm1516_vm10, 1.0, %v2835_v57  ;;  %v2006_v25 = vadd.f32 %v1978_v44, %v1824_v39  ;;  %v2687_v29 = vsel %vm1698_vm12, 1.0, %v2835_v57 }
 0x1d3   : > { %v2252_v10 = vpop.f32.mrf.mxu1  ;;  %v4352_v13 = vadd.f32 %v2324_v35, %v2323_v43  ;;  %v2015_v36 = vadd.f32 %v1987_v52, %v1833_v58  ;;  %v1621_v41 = vmul.f32 %v2659_v26, %v4213_v59  ;;  %v4375_v34 = vmul.f32 %v2194_v40, %v4289_v17 }
 0x1d4   : > { %v2270_v18 = vmul.f32 %v2252_v10, %v4490_v0  ;;  %v2014_v35 = vadd.f32 %v1986_v51, %v1832_v55  ;;  %vm1342_vm13 = vcmp.eq.f32.partialorder %v2911_v7, %v4101_v5  ;;  %v1812_v24 = vmul.f32 %v2696_v11, %v4488_v56 }
 0x1d5   : > { %v2326_v8 = vrot.slane %v4352_v13, 4  ;;  %v2724_v62 = vsel %vm1889_vm11, 1.0, %v2835_v57  ;;  %vm1880_vm14 = vcmp.eq.f32.partialorder %v2940_v50, %v4224_v15  ;;  %v2639_v31 = vsel %vm1342_vm13, 1.0, %v2835_v57 }
 0x1d6   : > { %v1658_v17 = vadd.f32 %v1630_v20, %v1448_v19  ;;  %v1649_v33 = vadd.f32 %v1621_v41, %v1439_v9  ;;  %v1447_v40 = vmul.f32 %v2639_v31, %v4130_v2  ;;  %vm1524_vm15 = vcmp.eq.f32.partialorder %v2911_v7, %v4103_v23 }
 0x1d7   : > { %v1803_v43 = vmul.f32 %v2687_v29, %v4233_v32  ;;  %v2667_v5 = vsel %vm1524_vm15, 1.0, %v2835_v57  ;;  %vm1706_vm1 = vcmp.eq.f32.partialorder %v2911_v7, %v4114_v3  ;;  %vm1888_vm5 = vcmp.eq.f32.partialorder %v2911_v7, %v4141_v38 }
 0x1d8   : > { %v2226_v21 = vpop.f32.mrf.mxu0  ;;  %v2353_v50 = vsel %vm2352_vm8, %v2270_v18, 0.0  ;;  %v2715_v56 = vsel %vm1880_vm14, 1.0, %v2835_v57  ;;  %v1629_v2 = vmul.f32 %v2667_v5, %v4132_v49  ;;  %v2695_v58 = vsel %vm1706_vm1, 1.0, %v2835_v57 }
 0x1d9   : > { %v1994_v23 = vmul.f32 %v2724_v62, %v4489_v30  ;;  %v1811_v47 = vmul.f32 %v2695_v58, %v4147_v16  ;;  %v2723_v44 = vsel %vm1888_vm5, 1.0, %v2835_v57  ;;  %vm1341_vm6 = vcmp.eq.f32.partialorder %v2911_v7, %v4173_v14 }
 0x1da   : > { %v4358_v28 = vpop.f32.mrf.mxu3  ;;  %v2276_v3 = vmul.f32 %v2226_v21, %v4316_v1  ;;  %v1840_v54 = vadd.f32 %v1812_v24, %v1658_v17  ;;  %v1657_v53 = vadd.f32 %v1629_v2, %v1447_v40  ;;  %v1993_v39 = vmul.f32 %v2723_v44, %v4169_v22 }
 0x1db   : > { %v2255_v61 = vpop.f32.mrf.mxu1  ;;  %v1831_v55 = vadd.f32 %v1803_v43, %v1649_v33  ;;  %v1985_v30 = vmul.f32 %v2715_v56, %v4251_v12  ;;  %v2638_v51 = vsel %vm1341_vm6, 1.0, %v2835_v57  ;;  %vm1523_vm7 = vcmp.eq.f32.partialorder %v2911_v7, %v4177_v6 }
 0x1dc   : > { %v2277_v49 = vmul.f32 %v2255_v61, %v4267_v27  ;;  %v1839_v16 = vadd.f32 %v1811_v47, %v1657_v53  ;;  %v1446_v48 = vmul.f32 %v2638_v51, %v4209_v63  ;;  %vm1705_vm9 = vcmp.eq.f32.partialorder %v2911_v7, %v4203_v42 }
 0x1dd   : > { %v2666_v22 = vsel %vm1523_vm7, 1.0, %v2835_v57  ;;  %v2694_v27 = vsel %vm1705_vm9, 1.0, %v2835_v57  ;;  %v2327_v21 = vadd.f32 %v2326_v8, %v4352_v13  ;;  %v2342_v11 = vadd.f32 %v2276_v3, %v2269_v46 }
 0x1de   : > { %v2021_v26 = vadd.f32 %v1993_v39, %v1839_v16  ;;  %v1628_v19 = vmul.f32 %v2666_v22, %v4213_v59  ;;  %v1810_v20 = vmul.f32 %v2694_v27, %v4233_v32  ;;  %v2354_v63 = vsel %vm2352_vm8, %v2277_v49, 0.0 }
 0x1df   : > { %v2275_v6 = vmul.f32 %v4358_v28, %v2006_v25  ;;  %vm1887_vm10 = vcmp.eq.f32.partialorder %v2911_v7, %v4224_v15  ;;  %v2022_v42 = vadd.f32 %v1994_v23, %v1840_v54  ;;  %v2013_v59 = vadd.f32 %v1985_v30, %v1831_v55 }
 0x1e0   : > { %v2229_v10 = vpop.f32.mrf.mxu0  ;;  %v1656_v9 = vadd.f32 %v1628_v19, %v1446_v48  ;;  %v2722_v41 = vsel %vm1887_vm10, 1.0, %v2835_v57  ;;  %v2355_v18 = vadd.f32 %v2354_v63, %v2353_v50  ;;  %vm2358_vm11 = vcmask 125952  }
 0x1e1   : > { %v2283_v1 = vmul.f32 %v2229_v10, %v2014_v35  ;;  %v1992_v32 = vmul.f32 %v2722_v41, %v4251_v12  ;;  %v2328_v25 = vrot.slane %v2327_v21, 2  ;;  %v2318_v24 = vrot.slane %v4286_v37, 2 }
 0x1e2   : > { %v2200_v52 = vpop.f32.mrf.mxu3  ;;  %v1838_v46 = vadd.f32 %v1810_v20, %v1656_v9  ;;  %v2297_v31 = vadd.f32 %v2296_v4, %v4314_v60  ;;  %v2332_v12 = vadd.f32 %v2275_v6, %v4375_v34  ;;  %v2308_v43 = vrot.slane %v4331_v45, 2 }
 0x1e3   : > { %v2258_v38 = vpop.f32.mrf.mxu1  ;;  %v2343_v0 = vadd.f32 %v2342_v11, %v2283_v1  ;;  %v2282_v7 = vmul.f32 %v2200_v52, %v2013_v59  ;;  %v2329_v5 = vadd.f32 %v2328_v25, %v2327_v21  ;;  %v2319_v23 = vadd.f32 %v2318_v24, %v4286_v37 }
 0x1e4   : > { %v2284_v14 = vmul.f32 %v2258_v38, %v2015_v36  ;;  %v2020_v62 = vadd.f32 %v1992_v32, %v1838_v46  ;;  %v2298_v52 = vrot.slane %v2297_v31, 2  ;;  %v2309_v4 = vadd.f32 %v2308_v43, %v4331_v45 }
 0x1e5   : > { %v2333_v50 = vadd.f32 %v2332_v12, %v2282_v7  ;;  %v2330_v34 = vrot.slane %v2329_v5, 1  ;;  %v2320_v53 = vrot.slane %v2319_v23, 1  ;;  %vm2384_vm12 = vcmask 1044484  }
 0x1e6   : > { %v2356_v13 = vsel %vm2352_vm8, %v2284_v14, 0.0  ;;  %v2299_v39 = vadd.f32 %v2298_v52, %v2297_v31  ;;  %v2310_v30 = vrot.slane %v2309_v4, 1  ;;  %vm2381_vm8 = vcmask 1042434  }
 0x1e7   : > { %v2357_v57 = vadd.f32 %v2356_v13, %v2355_v18  ;;  %v2331_v51 = vadd.f32 %v2330_v34, %v2329_v5  ;;  %v2321_v14 = vadd.f32 %v2320_v53, %v2319_v23 }
 0x1e8   : > { %v2232_v61 = vpop.f32.mrf.mxu0  ;;  %v2300_v1 = vrot.slane %v2299_v39, 1  ;;  %v2311_v27 = vadd.f32 %v2310_v30, %v2309_v4 }
 0x1e9   : > { %v2290_v36 = vmul.f32 %v2232_v61, %v2021_v26  ;;  %v2376_v21 = vrot.slane %v2331_v51, 5  ;;  %v2375_v20 = vrot.slane %v2321_v14, 6 }
 0x1ea   : > { %v2203_v29 = vpop.f32.mrf.mxu3  ;;  %v2301_v63 = vadd.f32 %v2300_v1, %v2299_v39  ;;  %v2374_v6 = vrot.slane %v2311_v27, 7 }
 0x1eb   : > { %v2261_v8 = vpop.f32.mrf.mxu1  ;;  %v2344_v28 = vsel %vm464_vm4, %v2290_v36, 0.0  ;;  %v2289_v10 = vmul.f32 %v2203_v29, %v2020_v62  ;;  %v2382_v61 = vsel %vm2381_vm8, %v2375_v20, %v2376_v21 }
 0x1ec   : > { %v2291_v35 = vmul.f32 %v2261_v8, %v2022_v42  ;;  %v2345_v15 = vadd.f32 %v2344_v28, %v2343_v0  ;;  %v2380_v41 = vsel %vm284_vm0, %v2301_v63, %v2374_v6  ;;  %v4491_v0 = vlaneseq }
 0x1ed   : > { %v2334_v58 = vsel %vm464_vm4, %v2289_v10, 0.0  ;;  %v2383_v59 = vsel %vm460_vm3, %v2380_v41, %v2382_v61 }
 0x1ee   : > { %v2359_v17 = vsel %vm2358_vm11, %v2291_v35, 0.0  ;;  %v2346_v33 = vrot.slane %v2345_v15, 4  ;;  %v2335_v44 = vadd.f32 %v2334_v58, %v2333_v50  ;;  %vm2391_vm13 = vcmp.lt.s32.totalorder %v4491_v0, 784 }
 0x1ef   : > { %v2360_v40 = vadd.f32 %v2359_v17, %v2357_v57 }
 0x1f0   : > { %v2347_v56 = vadd.f32 %v2346_v33, %v2345_v15  ;;  %v2336_v38 = vrot.slane %v2335_v44, 4 }
 0x1f1   : > { %v2361_v2 = vrot.slane %v2360_v40, 4 }
 0x1f2   : > { %v2348_v47 = vrot.slane %v2347_v56, 2  ;;  %v2337_v49 = vadd.f32 %v2336_v38, %v2335_v44 }
 0x1f3   : > { %v2362_v60 = vadd.f32 %v2361_v2, %v2360_v40 }
 0x1f4   : > { %v2349_v3 = vadd.f32 %v2348_v47, %v2347_v56  ;;  %v2338_v48 = vrot.slane %v2337_v49, 2 }
 0x1f5   : > { %v2363_v54 = vrot.slane %v2362_v60, 2 }
 0x1f6   : > { %v2350_v16 = vrot.slane %v2349_v3, 1  ;;  %v2339_v22 = vadd.f32 %v2338_v48, %v2337_v49 }
 0x1f7   : > { %v2364_v55 = vadd.f32 %v2363_v54, %v2362_v60 }
 0x1f8   : > { %v2351_v45 = vadd.f32 %v2350_v16, %v2349_v3  ;;  %v2340_v26 = vrot.slane %v2339_v22, 1 }
 0x1f9   : > { %v2365_v37 = vrot.slane %v2364_v55, 1 }
 0x1fa   : > { %v2341_v11 = vadd.f32 %v2340_v26, %v2339_v22  ;;  %v2378_v42 = vrot.slane %v2351_v45, 3 }
 0x1fb   : > { %v2366_v19 = vadd.f32 %v2365_v37, %v2364_v55 }
 0x1fc   : > { %v2377_v36 = vrot.slane %v2341_v11, 4 }
 0x1fd   : > { %v2379_v9 = vrot.slane %v2366_v19, 2 }
 0x1fe   : > { %v2385_v13 = vsel %vm2384_vm12, %v2377_v36, %v2378_v42 }
 0x1ff   : > { %v2386_v32 = vsel %vm462_vm2, %v2385_v13, %v2379_v9 }
 0x200   : > { %v2387_v18 = vsel %vm464_vm4, %v2383_v59, %v2386_v32 }
 0x201   : > { %2393 = vst.msk [vmem:[%s229_s13] sm:$0x7f] %vm2391_vm13, %v2387_v18 }
 0x202 PF: > { %s15_s15 = sadd.s32 1, %s2830_s15  }
 0x203   : > { %p12_p7 = scmp.ge.s32.totalorder %s15_s15, 4  }
 0x205   :  { %14 = sbr.rel (!%p12_p7) target bundleno = 1 (0x1), region = 74 }
 0x20a   :  { %2413 = vsyncpa [#allocation3], 1 }
 0x20b   :  { %2415 = vsyncpa [#allocation3 + $0x1], 1 }

</bundles_post_ra>
